<compile_context>
chip_gen: v5e
topology: v5e:2x2
jax: 0.10.0
libtpu: 0.0.40
codegen_flags: <defaults>
</compile_context>

<pallas_src>
import math
import functools

import jax
import jax.numpy as jnp
from jax import lax
from jax.experimental import pallas as pl
from jax.experimental.pallas import tpu as pltpu


def _round_up(x, m):
    return ((x + m - 1) // m) * m


def _apply_norm_clip(rows, max_norm, norm_type):
    """Scale rows whose Lp norm exceeds max_norm (guards zero rows)."""
    if max_norm is None:
        return rows
    if norm_type == 2.0:
        sumsq = jnp.sum(rows * rows, axis=-1, keepdims=True)
        scale = jnp.minimum(max_norm * lax.rsqrt(sumsq), 1.0)      # EUP rsqrt slot
        scale = jnp.where(sumsq > 0.0, scale, 1.0)                 # zero-row guard
    else:
        norm = jnp.sum(jnp.abs(rows) ** norm_type, axis=-1, keepdims=True) ** (1.0 / norm_type)
        scale = jnp.where(norm > 0.0, jnp.minimum(max_norm / norm, 1.0), 1.0)
    return rows * scale


def _embed_resident_kernel(idx_ref, w_ref, out_ref, *, padding_idx, max_norm, norm_type):
    """One grid step = TOK_BLOCK tokens against the full VMEM-resident table."""
    ids_col = idx_ref[...]                                     # (tb, 1) int32
    tb = ids_col.shape[0]
    vocab = w_ref.shape[0]
    if padding_idx is not None:
        # Fused padding mask: sentinel -1 never matches the iota.
        ids_col = jnp.where(ids_col == padding_idx, -1, ids_col)
    iota = lax.broadcasted_iota(jnp.int32, (tb, vocab), 1)
    onehot = (ids_col == iota)
    acc_dtype = jnp.float32 if max_norm is not None else out_ref.dtype
    rows = jnp.dot(onehot.astype(w_ref.dtype), w_ref[...],
                   preferred_element_type=acc_dtype)           # (tb, D) MXU gather
    rows = _apply_norm_clip(rows, max_norm, norm_type)
    out_ref[...] = rows.astype(out_ref.dtype)


def _embed_streamed_kernel(idx_ref, w_ref, out_ref, acc_ref, *, padding_idx, max_norm,
                           norm_type, v_tile):
    """grid=(token_blocks, vocab_tiles): table streamed HBM->VMEM, f32 accumulator."""
    k = pl.program_id(1)

    @pl.when(k == 0)
    def _():
        acc_ref[...] = jnp.zeros_like(acc_ref)

    ids_col = idx_ref[...]                                     # (tb, 1) int32
    tb = ids_col.shape[0]
    if padding_idx is not None:
        ids_col = jnp.where(ids_col == padding_idx, -1, ids_col)
    # One-hot against the current vocab chunk only; ids outside
    # [k*v_tile, (k+1)*v_tile) never match -> implicit range mask.
    iota = k * v_tile + lax.broadcasted_iota(jnp.int32, (tb, v_tile), 1)
    onehot = (ids_col == iota)
    acc_ref[...] += jnp.dot(onehot.astype(w_ref.dtype), w_ref[...],
                            preferred_element_type=jnp.float32)

    @pl.when(k == pl.num_programs(1) - 1)
    def _():
        rows = _apply_norm_clip(acc_ref[...], max_norm, norm_type)
        out_ref[...] = rows.astype(out_ref.dtype)


def pallas_embedding(indices, weight, padding_idx=None, max_norm=None, norm_type=2.0,
                     tok_block=512, vocab_tile=None):
    """JAX wrapper: picks a VMEM-resident or vocab-tiled streamed kernel."""
    orig_shape = indices.shape
    idx_flat = indices.reshape(-1).astype(jnp.int32)
    n_tok = idx_flat.shape[0]
    vocab, dim = weight.shape
    itemsize = jnp.dtype(weight.dtype).itemsize

    # Lane-dense feature dim: pad to a multiple of 128 (zeros don't change Lp
    # norms, so the max_norm clip stays exact); output is sliced back below.
    dim_p = _round_up(dim, 128)
    weight_p = weight if dim_p == dim else jnp.pad(weight, ((0, 0), (0, dim_p - dim)))

    # Token block: multiple of 128 -> dense stores / full MXU M-dim passes.
    tb = min(_round_up(tok_block, 128), _round_up(max(n_tok, 1), 128))
    padded_n = _round_up(n_tok, tb)
    if padded_n != n_tok:
        idx_flat = jnp.pad(idx_flat, (0, padded_n - n_tok))
    n_blocks = padded_n // tb
    idx_col = idx_flat.reshape(padded_n, 1)          # column layout, no in-kernel transpose

    # Generation-aware VMEM budget (v7x: 64 MiB/TC vs 128 MiB on v5e/v6e).
    try:
        vmem_cap = int(pltpu.get_tpu_info().vmem_capacity_bytes)
    except Exception:
        vmem_cap = 64 << 20
    vmem_budget = max(int(vmem_cap * 0.70), 16 << 20)

    table_bytes = vocab * dim_p * itemsize
    block_bytes = tb * dim_p * itemsize + tb * 4     # out block + idx block
    # Conservative: assume the resident table may still be double-buffered if
    # pl.Buffered(1) is not honoured by this jax version.
    resident_needed = 2 * table_bytes + 2 * block_bytes + (2 << 20)
    use_stream = (vocab_tile is not None) or (resident_needed > vmem_budget)

    common = dict(padding_idx=padding_idx, max_norm=max_norm, norm_type=float(norm_type))

    if not use_stream:
        # ---------------- VMEM-resident table path ----------------
        kernel = functools.partial(_embed_resident_kernel, **common)
        cost = pl.CostEstimate(
            flops=int(2 * padded_n * vocab * dim_p),
            transcendentals=0,
            bytes_accessed=int(table_bytes + padded_n * (dim_p * itemsize + 4)))
        vmem_limit = int(min(max(resident_needed, 16 << 20), vmem_budget))

        def run(single_buffer_table):
            if single_buffer_table:
                table_spec = pl.BlockSpec((vocab, dim_p), lambda i: (0, 0),
                                          pipeline_mode=pl.Buffered(1))
            else:
                table_spec = pl.BlockSpec((vocab, dim_p), lambda i: (0, 0))
            return pl.pallas_call(
                kernel,
                out_shape=jax.ShapeDtypeStruct((padded_n, dim_p), weight.dtype),
                grid_spec=pltpu.PrefetchScalarGridSpec(
                    num_scalar_prefetch=0,
                    grid=(n_blocks,),
                    in_specs=[pl.BlockSpec((tb, 1), lambda i: (i, 0)), table_spec],
                    out_specs=pl.BlockSpec((tb, dim_p), lambda i: (i, 0)),
                ),
                compiler_params=pltpu.CompilerParams(
                    dimension_semantics=("parallel",),
                    vmem_limit_bytes=vmem_limit,
                ),
                cost_estimate=cost,
            )(idx_col, weight_p)

        try:
            out = jax.block_until_ready(run(True))     # single-buffered resident table
        except Exception:
            out = run(False)                           # fallback: default buffering
    else:
        # ---------------- Vocab-tiled streaming path ----------------
        v_tile = vocab_tile if vocab_tile is not None else 512
        v_tile = max(8, _round_up(int(v_tile), 8))
        vocab_p = _round_up(vocab, v_tile)
        w_s = weight_p if vocab_p == vocab else jnp.pad(weight_p,
                                                        ((0, vocab_p - vocab), (0, 0)))
        n_vtiles = vocab_p // v_tile

        kernel = functools.partial(_embed_streamed_kernel, v_tile=v_tile, **common)
        cost = pl.CostEstimate(
            flops=int(2 * padded_n * vocab_p * dim_p),
            transcendentals=0,
            bytes_accessed=int(n_blocks * vocab_p * dim_p * itemsize
                               + padded_n * (dim_p * itemsize + 4)))
        stream_needed = (2 * v_tile * dim_p * itemsize   # double-buffered table tiles
                         + 2 * block_bytes               # out + idx blocks
                         + tb * dim_p * 4                # f32 accumulator scratch
                         + (2 << 20))
        vmem_limit = int(min(max(stream_needed, 16 << 20), vmem_budget))

        out = pl.pallas_call(
            kernel,
            out_shape=jax.ShapeDtypeStruct((padded_n, dim_p), weight.dtype),
            grid_spec=pltpu.PrefetchScalarGridSpec(
                num_scalar_prefetch=0,
                grid=(n_blocks, n_vtiles),
                in_specs=[
                    pl.BlockSpec((tb, 1), lambda i, k: (i, 0)),
                    pl.BlockSpec((v_tile, dim_p), lambda i, k: (k, 0)),
                ],
                out_specs=pl.BlockSpec((tb, dim_p), lambda i, k: (i, 0)),
                scratch_shapes=[pltpu.VMEM((tb, dim_p), jnp.float32)],
            ),
            compiler_params=pltpu.CompilerParams(
                dimension_semantics=("parallel", "arbitrary"),
                vmem_limit_bytes=vmem_limit,
            ),
            cost_estimate=cost,
        )(idx_col, w_s)

    out = out[:n_tok, :dim]
    return out.reshape(orig_shape + (dim,))


def make_embedding_params(key, num_embeddings, embedding_dim, padding_idx=None,
                          dtype=jnp.float32):
    """Deterministic re-implementation of Embedding.reset_parameters()."""
    w = jax.random.normal(key, (num_embeddings, embedding_dim), dtype=dtype)
    w = w * (1.0 / math.sqrt(embedding_dim))
    if padding_idx is not None:
        w = w.at[padding_idx].set(0.0)
    return w


def _reference_embedding(indices, weight, padding_idx, max_norm, norm_type):
    out = weight[indices]
    if padding_idx is not None:
        mask = (indices == padding_idx)[..., None]
        out = jnp.where(mask, 0.0, out)
    if max_norm is not None:
        norms = jnp.sum(jnp.abs(out) ** norm_type, axis=-1, keepdims=True) ** (1.0 / norm_type)
        out = out * jnp.minimum(max_norm / norms, 1.0)
    return out


if __name__ == "__main__":
    key = jax.random.PRNGKey(0)
    k_w1, k_idx1, k_w2, k_idx2 = jax.random.split(key, 4)

    # --- Paths 1 & 2: small vocab -> VMEM-resident table kernel ---
    num_embeddings, embedding_dim = 32, 128
    padding_idx, max_norm, norm_type = 0, 1.0, 2.0
    weight = make_embedding_params(k_w1, num_embeddings, embedding_dim, padding_idx)
    indices = jax.random.randint(k_idx1, (2, 8), 0, num_embeddings, dtype=jnp.int32)
    indices = indices.at[0, 3].set(padding_idx)

    out = jax.block_until_ready(
        pallas_embedding(indices, weight, padding_idx=padding_idx,
                         max_norm=max_norm, norm_type=norm_type))
    ref = _reference_embedding(indices, weight, padding_idx, max_norm, norm_type)
    assert out.shape == (2, 8, embedding_dim)
    assert jnp.allclose(out, ref, atol=1e-5, rtol=1e-5)

    out2 = jax.block_until_ready(
        pallas_embedding(indices, weight, padding_idx=padding_idx))
    ref2 = _reference_embedding(indices, weight, padding_idx, None, norm_type)
    assert jnp.allclose(out2, ref2, atol=1e-6, rtol=1e-6)

    # --- Path 3: forced vocab-tiled streaming kernel (also exercises dim padding) ---
    n_emb3, dim3, pad3, max_norm3 = 512, 96, 5, 0.75
    weight3 = make_embedding_params(k_w2, n_emb3, dim3, pad3)
    indices3 = jax.random.randint(k_idx2, (2, 8), 0, n_emb3, dtype=jnp.int32)
    indices3 = indices3.at[1, 2].set(pad3)
    out3 = jax.block_until_ready(
        pallas_embedding(indices3, weight3, padding_idx=pad3, max_norm=max_norm3,
                         norm_type=2.0, vocab_tile=128))
    ref3 = _reference_embedding(indices3, weight3, pad3, max_norm3, 2.0)
    assert out3.shape == (2, 8, dim3)
    assert jnp.allclose(out3, ref3, atol=1e-5, rtol=1e-5)

    print("KERNEL_OK")
</pallas_src>

<mosaic_0001>
module attributes {stable_mosaic.version = 11 : i64} {
  func.func @_embed_resident_kernel(%arg0: i32, %arg1: memref<128x1xi32, #tpu.memory_space<vmem>>, %arg2: memref<32x128xf32, #tpu.memory_space<vmem>>, %arg3: memref<128x128xf32, #tpu.memory_space<vmem>>) attributes {dimension_semantics = [#tpu.dimension_semantics<parallel>], iteration_bounds = array<i64: 1>, scalar_prefetch = 0 : i64, scratch_operands = 0 : i64, tpu.core_type = #tpu.core_type<tc>, window_params = [{transform_indices = @transform_0, window_bounds = array<i64: 128, 1>}, {pipeline_mode = #tpu.pipeline_mode<synchronous>, transform_indices = @transform_1, window_bounds = array<i64: 32, 128>}, {transform_indices = @transform_2, window_bounds = array<i64: 128, 128>}]} {
    %c0 = arith.constant 0 : index
    %c0_0 = arith.constant 0 : index
    %0 = vector.load %arg1[%c0, %c0_0] : memref<128x1xi32, #tpu.memory_space<vmem>>, vector<128x1xi32>
    %c0_i32 = arith.constant 0 : i32
    %1 = vector.broadcast %c0_i32 : i32 to vector<128x1xi32>
    %2 = arith.cmpi eq, %0, %1 : vector<128x1xi32>
    %c-1_i32 = arith.constant -1 : i32
    %3 = vector.broadcast %c-1_i32 : i32 to vector<128x1xi32>
    %4 = arith.select %2, %3, %0 : vector<128x1xi1>, vector<128x1xi32>
    %5 = tpu.iota {dimensions = array<i32: 1>} : vector<128x32xi32>
    %6 = vector.broadcast %4 : vector<128x1xi32> to vector<128x32xi32>
    %7 = arith.cmpi eq, %6, %5 : vector<128x32xi32>
    %8 = arith.extui %7 : vector<128x32xi1> to vector<128x32xi32>
    %9 = arith.sitofp %8 : vector<128x32xi32> to vector<128x32xf32>
    %c0_1 = arith.constant 0 : index
    %c0_2 = arith.constant 0 : index
    %10 = vector.load %arg2[%c0_1, %c0_2] : memref<32x128xf32, #tpu.memory_space<vmem>>, vector<32x128xf32>
    %cst = arith.constant dense<0.000000e+00> : vector<128x128xf32>
    %11 = tpu.matmul %9, %10, %cst {dimension_numbers = #tpu.dot_dimension_numbers<[1], [0], [0], [1], [0, 0, 1, 1], [], []>} : vector<128x32xf32>, vector<32x128xf32>, vector<128x128xf32> -> vector<128x128xf32>
    %12 = arith.mulf %11, %11 : vector<128x128xf32>
    %cst_3 = arith.constant dense<0.000000e+00> : vector<128xf32>
    %13 = vector.multi_reduction <add>, %12, %cst_3 [1] : vector<128x128xf32> to vector<128xf32>
    %14 = vector.shape_cast %13 : vector<128xf32> to vector<128x1xf32>
    %15 = math.rsqrt %14 : vector<128x1xf32>
    %cst_4 = arith.constant 1.000000e+00 : f32
    %16 = vector.broadcast %cst_4 : f32 to vector<128x1xf32>
    %17 = arith.mulf %16, %15 : vector<128x1xf32>
    %cst_5 = arith.constant 1.000000e+00 : f32
    %18 = vector.broadcast %cst_5 : f32 to vector<128x1xf32>
    %19 = arith.minimumf %17, %18 : vector<128x1xf32>
    %cst_6 = arith.constant 0.000000e+00 : f32
    %20 = vector.broadcast %cst_6 : f32 to vector<128x1xf32>
    %21 = arith.cmpf ogt, %14, %20 : vector<128x1xf32>
    %cst_7 = arith.constant 1.000000e+00 : f32
    %22 = vector.broadcast %cst_7 : f32 to vector<128x1xf32>
    %23 = arith.select %21, %19, %22 : vector<128x1xi1>, vector<128x1xf32>
    %24 = vector.broadcast %23 : vector<128x1xf32> to vector<128x128xf32>
    %25 = arith.mulf %11, %24 : vector<128x128xf32>
    %c0_8 = arith.constant 0 : index
    %c0_9 = arith.constant 0 : index
    %26 = vector.load %arg3[%c0_8, %c0_9] : memref<128x128xf32, #tpu.memory_space<vmem>>, vector<128x128xf32>
    tpu.vector_store %arg3[%c0_8, %c0_9], %25 {strides = array<i32>} : memref<128x128xf32, #tpu.memory_space<vmem>>, vector<128x128xf32>,
    return
  }
  func.func @transform_0(%arg0: i32) -> (i32, i32) {
    %c0_i32 = arith.constant 0 : i32
    %c0_i32_0 = arith.constant 0 : i32
    return %arg0, %c0_i32 : i32, i32
  }
  func.func @transform_1(%arg0: i32) -> (i32, i32) {
    %c0_i32 = arith.constant 0 : i32
    %c0_i32_0 = arith.constant 0 : i32
    %c0_i32_1 = arith.constant 0 : i32
    return %c0_i32, %c0_i32_0 : i32, i32
  }
  func.func @transform_2(%arg0: i32) -> (i32, i32) {
    %c0_i32 = arith.constant 0 : i32
    %c0_i32_0 = arith.constant 0 : i32
    return %arg0, %c0_i32 : i32, i32
  }
}

module attributes {stable_mosaic.version = 11 : i64} {
  func.func @_embed_resident_kernel(%arg0: i32, %arg1: memref<128x1xi32, #tpu.memory_space<vmem>>, %arg2: memref<32x128xf32, #tpu.memory_space<vmem>>, %arg3: memref<128x128xf32, #tpu.memory_space<vmem>>) attributes {dimension_semantics = [#tpu.dimension_semantics<parallel>], iteration_bounds = array<i64: 1>, scalar_prefetch = 0 : i64, scratch_operands = 0 : i64, tpu.core_type = #tpu.core_type<tc>, window_params = [{transform_indices = @transform_0, window_bounds = array<i64: 128, 1>}, {pipeline_mode = #tpu.pipeline_mode<synchronous>, transform_indices = @transform_1, window_bounds = array<i64: 32, 128>}, {transform_indices = @transform_2, window_bounds = array<i64: 128, 128>}]} {
    %c0 = arith.constant 0 : index
    %c0_0 = arith.constant 0 : index
    %0 = vector.load %arg1[%c0, %c0_0] : memref<128x1xi32, #tpu.memory_space<vmem>>, vector<128x1xi32>
    %c0_i32 = arith.constant 0 : i32
    %1 = vector.broadcast %c0_i32 : i32 to vector<128x1xi32>
    %2 = arith.cmpi eq, %0, %1 : vector<128x1xi32>
    %c-1_i32 = arith.constant -1 : i32
    %3 = vector.broadcast %c-1_i32 : i32 to vector<128x1xi32>
    %4 = arith.select %2, %3, %0 : vector<128x1xi1>, vector<128x1xi32>
    %5 = tpu.iota {dimensions = array<i32: 1>} : vector<128x32xi32>
    %6 = vector.broadcast %4 : vector<128x1xi32> to vector<128x32xi32>
    %7 = arith.cmpi eq, %6, %5 : vector<128x32xi32>
    %8 = arith.extui %7 : vector<128x32xi1> to vector<128x32xi32>
    %9 = arith.sitofp %8 : vector<128x32xi32> to vector<128x32xf32>
    %c0_1 = arith.constant 0 : index
    %c0_2 = arith.constant 0 : index
    %10 = vector.load %arg2[%c0_1, %c0_2] : memref<32x128xf32, #tpu.memory_space<vmem>>, vector<32x128xf32>
    %cst = arith.constant dense<0.000000e+00> : vector<128x128xf32>
    %11 = tpu.matmul %9, %10, %cst {dimension_numbers = #tpu.dot_dimension_numbers<[1], [0], [0], [1], [0, 0, 1, 1], [], []>} : vector<128x32xf32>, vector<32x128xf32>, vector<128x128xf32> -> vector<128x128xf32>
    %12 = arith.mulf %11, %11 : vector<128x128xf32>
    %cst_3 = arith.constant dense<0.000000e+00> : vector<128xf32>
    %13 = vector.multi_reduction <add>, %12, %cst_3 [1] : vector<128x128xf32> to vector<128xf32>
    %14 = vector.shape_cast %13 : vector<128xf32> to vector<128x1xf32>
    %15 = math.rsqrt %14 : vector<128x1xf32>
    %cst_4 = arith.constant 1.000000e+00 : f32
    %16 = vector.broadcast %cst_4 : f32 to vector<128x1xf32>
    %17 = arith.mulf %16, %15 : vector<128x1xf32>
    %cst_5 = arith.constant 1.000000e+00 : f32
    %18 = vector.broadcast %cst_5 : f32 to vector<128x1xf32>
    %19 = arith.minimumf %17, %18 : vector<128x1xf32>
    %cst_6 = arith.constant 0.000000e+00 : f32
    %20 = vector.broadcast %cst_6 : f32 to vector<128x1xf32>
    %21 = arith.cmpf ogt, %14, %20 : vector<128x1xf32>
    %cst_7 = arith.constant 1.000000e+00 : f32
    %22 = vector.broadcast %cst_7 : f32 to vector<128x1xf32>
    %23 = arith.select %21, %19, %22 : vector<128x1xi1>, vector<128x1xf32>
    %24 = vector.broadcast %23 : vector<128x1xf32> to vector<128x128xf32>
    %25 = arith.mulf %11, %24 : vector<128x128xf32>
    %c0_8 = arith.constant 0 : index
    %c0_9 = arith.constant 0 : index
    %26 = vector.load %arg3[%c0_8, %c0_9] : memref<128x128xf32, #tpu.memory_space<vmem>>, vector<128x128xf32>
    tpu.vector_store %arg3[%c0_8, %c0_9], %25 {strides = array<i32>} : memref<128x128xf32, #tpu.memory_space<vmem>>, vector<128x128xf32>,
    return
  }
  func.func @transform_0(%arg0: i32) -> (i32, i32) {
    %c0_i32 = arith.constant 0 : i32
    %c0_i32_0 = arith.constant 0 : i32
    return %arg0, %c0_i32 : i32, i32
  }
  func.func @transform_1(%arg0: i32) -> (i32, i32) {
    %c0_i32 = arith.constant 0 : i32
    %c0_i32_0 = arith.constant 0 : i32
    %c0_i32_1 = arith.constant 0 : i32
    return %c0_i32, %c0_i32_0 : i32, i32
  }
  func.func @transform_2(%arg0: i32) -> (i32, i32) {
    %c0_i32 = arith.constant 0 : i32
    %c0_i32_0 = arith.constant 0 : i32
    return %arg0, %c0_i32 : i32, i32
  }
}

</mosaic_0001>

<bundles_post_ra>
// kernel: tpu_custom_call.1
= control target key start
LH: loop header
LB: loop body
LE: loop exit
PB: predicated region body
PF: predicated region fallthrough
CT: control target
= control target key end

     0   :  { %v692_v3 = vmov 0   ;;  %s1012_s0 = inlined_call_operand.vmem [shape: s32[128,1], index: 0, kind: input, shape index: {}]   ;;  %s1013_s1 = inlined_call_operand.vmem [shape: f32[32,128], index: 1, kind: input, shape index: {}]   ;;  %s1014_s2 = inlined_call_operand.hbm [shape: f32[128,128], index: 2, kind: output, shape index: {}]  }
   0x1   :  { %v21_v0 = vld [vmem:[%s1012_s0 + $0x48] sm:$0xff]  ;;  %v20_v1 = vld [vmem:[%s1012_s0 + $0x40] sm:$0xff]  ;;  %633 = vset.pattern.permute.xlu2 %v692_v3  ;;  %632 = vset.pattern.permute.xlu1 %v692_v3 }
   0x2   :  { %v12_v2 = vld [vmem:[%s1012_s0] sm:$0xff]  ;;  %vm37_vm0 = vcmp.eq.s32.totalorder %v21_v0, 0  ;;  %vm36_vm1 = vcmp.eq.s32.totalorder %v20_v1, 0  ;;  %631 = vset.pattern.permute.xlu0 %v692_v3  ;;  %v25_v7 = vld [vmem:[%s1012_s0 + $0x68] sm:$0xff] }
   0x3   :  { %vm28_vm2 = vcmp.eq.s32.totalorder %v12_v2, 0  ;;  %v53_v4 = vsel %vm37_vm0, 4294967295, %v21_v0  ;;  %v52_v5 = vsel %vm36_vm1, 4294967295, %v20_v1  ;;  %v24_v8 = vld [vmem:[%s1012_s0 + $0x60] sm:$0xff]  ;;  %vm41_vm3 = vcmp.eq.s32.totalorder %v25_v7, 0 }
   0x4   :  { %v44_v6 = vsel %vm28_vm2, 4294967295, %v12_v2  ;;  %90 = vperm.xlu2 %633, %v53_v4   ;;  %87 = vperm.xlu0 %631, %v52_v5   ;;  %v16_v9 = vld [vmem:[%s1012_s0 + $0x20] sm:$0xff]  ;;  %vm40_vm4 = vcmp.eq.s32.totalorder %v24_v8, 0 }
   0x5   :  { %63 = vperm.xlu1 %632, %v44_v6   ;;  %vm32_vm5 = vcmp.eq.s32.totalorder %v16_v9, 0 }
   0x6   :  { %7 = vsyncpa [#allocation3], 0  ;;  %v57_v10 = vsel %vm41_vm3, 4294967295, %v25_v7  ;;  %v56_v11 = vsel %vm40_vm4, 4294967295, %v24_v8  ;;  %v48_v12 = vsel %vm32_vm5, 4294967295, %v16_v9  ;;  %v22_v13 = vld [vmem:[%s1012_s0 + $0x50] sm:$0xff]  ;;  %v60_v38 = vlaneseq }
   0x7   :  { %v13_v14 = vld [vmem:[%s1012_s0 + $0x8] sm:$0xff]  ;;  %vm38_vm6 = vcmp.eq.s32.totalorder %v22_v13, 0  ;;  %v18_v19 = vld [vmem:[%s1012_s0 + $0x30] sm:$0xff]  ;;  %v15_v25 = vld [vmem:[%s1012_s0 + $0x18] sm:$0xff]  ;;  %vm162_vm0 = vcmask 261120   ;;  %v693_v43 = vmov 0.0  }
   0x8   :  { %v17_v15 = vld [vmem:[%s1012_s0 + $0x28] sm:$0xff]  ;;  %vm29_vm7 = vcmp.eq.s32.totalorder %v13_v14, 0  ;;  %v54_v16 = vsel %vm38_vm6, 4294967295, %v22_v13  ;;  %v26_v20 = vld [vmem:[%s1012_s0 + $0x70] sm:$0xff]  ;;  %vm34_vm9 = vcmp.eq.s32.totalorder %v18_v19, 0  ;;  %v23_v26 = vld [vmem:[%s1012_s0 + $0x58] sm:$0xff] }
   0x9   :  { %vm33_vm8 = vcmp.eq.s32.totalorder %v17_v15, 0  ;;  %v45_v17 = vsel %vm29_vm7, 4294967295, %v13_v14  ;;  %v14_v21 = vld [vmem:[%s1012_s0 + $0x10] sm:$0xff]  ;;  %vm42_vm10 = vcmp.eq.s32.totalorder %v26_v20, 0  ;;  %v50_v22 = vsel %vm34_vm9, 4294967295, %v18_v19  ;;  %v27_v27 = vld [vmem:[%s1012_s0 + $0x78] sm:$0xff] }
   0xa   :  { %v49_v18 = vsel %vm33_vm8, 4294967295, %v17_v15  ;;  %vm30_vm11 = vcmp.eq.s32.totalorder %v14_v21, 0  ;;  %v58_v23 = vsel %vm42_vm10, 4294967295, %v26_v20  ;;  %vm31_vm12 = vcmp.eq.s32.totalorder %v15_v25, 0  ;;  %v19_v31 = vld [vmem:[%s1012_s0 + $0x38] sm:$0xff]  ;;  %v160_v34 = vld [vmem:[%s1013_s1 + $0x10] sm:$0xff] }
   0xb   :  { %v46_v24 = vsel %vm30_vm11, 4294967295, %v14_v21  ;;  %vm39_vm13 = vcmp.eq.s32.totalorder %v23_v26, 0  ;;  %vm43_vm14 = vcmp.eq.s32.totalorder %v27_v27, 0  ;;  %v47_v28 = vsel %vm31_vm12, 4294967295, %v15_v25  ;;  %v161_v33 = vld [vmem:[%s1013_s1 + $0x18] sm:$0xff]  ;;  %v159_v35 = vld [vmem:[%s1013_s1 + $0x8] sm:$0xff] }
   0xc   :  { %102 = vperm.xlu2 %633, %v57_v10   ;;  %99 = vperm.xlu0 %631, %v56_v11   ;;  %v55_v29 = vsel %vm39_vm13, 4294967295, %v23_v26  ;;  %v59_v30 = vsel %vm43_vm14, 4294967295, %v27_v27  ;;  %vm35_vm15 = vcmp.eq.s32.totalorder %v19_v31, 0  ;;  %v158_v36 = vld [vmem:[%s1013_s1] sm:$0xff]  ;;  %v772_v39 = vand.u32 127, %v60_v38  ;;  %s694_s1 = smov [#allocation2]  }
   0xd   :  { %75 = vperm.xlu1 %632, %v48_v12   ;;  %v51_v32 = vsel %vm35_vm15, 4294967295, %v19_v31  ;;  %223 = vmatpush.msra.mxu0 %v161_v33  ;;  %s568_s20 = sshll.u32 %s694_s1, 4  ;;  %s570_s23 = sshll.u32 %s1014_s2, 4  ;;  %s569_s20 = int_to_ptr.vmem [resolvable:$true] %s568_s20  ;;  %s571_s23 = int_to_ptr.hbm [resolvable:$true] %s570_s23 }
   0xe   :  { %615 = vmatpush.msra.mxu2 %v161_v33  ;;  %614 = vmatpush.msra.mxu1 %v161_v33  ;;  %s695_s24 = smov 128   ;;  %s696_s25 = smov 8  }
   0xf   :  { %616 = vmatpush.msra.mxu3 %v161_v33  ;;  %224 = vmatpush.msra.mxu0 %v160_v34 }
  0x10   :  { %618 = vmatpush.msra.mxu2 %v160_v34  ;;  %617 = vmatpush.msra.mxu1 %v160_v34 }
  0x11   :  { %619 = vmatpush.msra.mxu3 %v160_v34  ;;  %225 = vmatpush.msra.mxu0 %v159_v35 }
  0x12   :  { %621 = vmatpush.msra.mxu2 %v159_v35  ;;  %620 = vmatpush.msra.mxu1 %v159_v35 }
  0x13   :  { %622 = vmatpush.msra.mxu3 %v159_v35  ;;  %226 = vmatpush.msra.mxu0 %v158_v36 }
  0x14   :  { %93 = vperm.xlu2 %633, %v54_v16   ;;  %66 = vperm.xlu0 %631, %v45_v17  }
  0x15   :  { %78 = vperm.xlu1 %632, %v49_v18   ;;  %624 = vmatpush.msra.mxu2 %v158_v36 }
  0x16   :  { %623 = vmatpush.msra.mxu1 %v158_v36  ;;  %625 = vmatpush.msra.mxu3 %v158_v36 }
  0x1c   :  { %81 = vperm.xlu2 %633, %v50_v22   ;;  %105 = vperm.xlu0 %631, %v58_v23  }
  0x1d   :  { %69 = vperm.xlu1 %632, %v46_v24  }
  0x24   :  { %72 = vperm.xlu2 %633, %v47_v28   ;;  %96 = vperm.xlu0 %631, %v55_v29  }
  0x25   :  { %108 = vperm.xlu1 %632, %v59_v30  }
  0x2c   :  { %84 = vperm.xlu0 %631, %v51_v32  }
  0x5e   :  { %v91_v37 = vpop.permute.xlu2 %90 }
  0x5f   :  { %vm119_vm3 = vcmp.eq.s32.totalorder %v91_v37, %v772_v39 }
  0x60   :  { %v591_v49 = vsel %vm119_vm3, 1.0, %v693_v43 }
  0x66   :  { %v103_v40 = vpop.permute.xlu2 %102 }
  0x67   :  { %vm123_vm7 = vcmp.eq.s32.totalorder %v103_v40, %v772_v39 }
  0x68   :  { %v595_v56 = vsel %vm123_vm7, 1.0, %v693_v43 }
  0x6e   :  { %v94_v47 = vpop.permute.xlu2 %93 }
  0x6f   :  { %vm120_vm6 = vcmp.eq.s32.totalorder %v94_v47, %v772_v39 }
  0x70   :  { %v592_v54 = vsel %vm120_vm6, 1.0, %v693_v43 }
  0x76   :  { %v88_v41 = vpop.permute.xlu0 %87  ;;  %v82_v57 = vpop.permute.xlu2 %81 }
  0x77   :  { %vm118_vm1 = vcmp.eq.s32.totalorder %v88_v41, %v772_v39  ;;  %v64_v42 = vpop.permute.xlu1 %63  ;;  %vm116_vm10 = vcmp.eq.s32.totalorder %v82_v57, %v772_v39 }
  0x78   :  { %v590_v44 = vsel %vm118_vm1, 1.0, %v693_v43  ;;  %vm110_vm2 = vcmp.eq.s32.totalorder %v64_v42, %v772_v39  ;;  %v588_v62 = vsel %vm116_vm10, 1.0, %v693_v43 }
  0x79   :  { %v582_v45 = vsel %vm110_vm2, 1.0, %v693_v43  ;;  %606 = vmatmul.msk.f32.vlgmr.msra.gmra.mxu2 %vm162_vm0, %v590_v44 }
  0x7a   :  { %598 = vmatmul.msk.f32.vlgmr.msra.gmra.mxu0 %vm162_vm0, %v582_v45 }
  0x7e   :  { %v100_v46 = vpop.permute.xlu0 %99  ;;  %v73_v0 = vpop.permute.xlu2 %72 }
  0x7f   :  { %vm122_vm4 = vcmp.eq.s32.totalorder %v100_v46, %v772_v39  ;;  %v76_v48 = vpop.permute.xlu1 %75  ;;  %vm113_vm13 = vcmp.eq.s32.totalorder %v73_v0, %v772_v39 }
  0x80   :  { %v594_v50 = vsel %vm122_vm4, 1.0, %v693_v43  ;;  %vm114_vm5 = vcmp.eq.s32.totalorder %v76_v48, %v772_v39  ;;  %v585_v4 = vsel %vm113_vm13, 1.0, %v693_v43 }
  0x81   :  { %v586_v51 = vsel %vm114_vm5, 1.0, %v693_v43  ;;  %607 = vmatmul.msk.f32.gmra.mxu2 %vm162_vm0, %v591_v49  ;;  %610 = vmatmul.msk.f32.vlgmr.msra.gmra.mxu3 %vm162_vm0, %v594_v50 }
  0x82   :  { %602 = vmatmul.msk.f32.vlgmr.msra.gmra.mxu1 %vm162_vm0, %v586_v51 }
  0x86   :  { %v67_v52 = vpop.permute.xlu0 %66 }
  0x87   :  { %vm111_vm8 = vcmp.eq.s32.totalorder %v67_v52, %v772_v39  ;;  %v79_v53 = vpop.permute.xlu1 %78 }
  0x88   :  { %v583_v55 = vsel %vm111_vm8, 1.0, %v693_v43  ;;  %vm115_vm9 = vcmp.eq.s32.totalorder %v79_v53, %v772_v39 }
  0x89   :  { %v587_v58 = vsel %vm115_vm9, 1.0, %v693_v43  ;;  %599 = vmatmul.msk.f32.gmra.mxu0 %vm162_vm0, %v583_v55  ;;  %608 = vmatmul.msk.f32.gmra.mxu2 %vm162_vm0, %v592_v54 }
  0x8a   :  { %603 = vmatmul.msk.f32.gmra.mxu1 %vm162_vm0, %v587_v58  ;;  %611 = vmatmul.msk.f32.gmra.mxu3 %vm162_vm0, %v595_v56 }
  0x8e   :  { %v106_v59 = vpop.permute.xlu0 %105 }
  0x8f   :  { %vm124_vm11 = vcmp.eq.s32.totalorder %v106_v59, %v772_v39  ;;  %v70_v60 = vpop.permute.xlu1 %69 }
  0x90   :  { %v596_v61 = vsel %vm124_vm11, 1.0, %v693_v43  ;;  %vm112_vm12 = vcmp.eq.s32.totalorder %v70_v60, %v772_v39 }
  0x91   :  { %v584_v63 = vsel %vm112_vm12, 1.0, %v693_v43 }
  0x92   :  { %600 = vmatmul.msk.f32.gmra.mxu0 %vm162_vm0, %v584_v63  ;;  %604 = vmatmul.msk.f32.gmra.mxu1 %vm162_vm0, %v588_v62 }
  0x93   :  { %612 = vmatmul.msk.f32.gmra.mxu3 %vm162_vm0, %v596_v61 }
  0x96   :  { %v97_v1 = vpop.permute.xlu0 %96 }
  0x97   :  { %vm121_vm14 = vcmp.eq.s32.totalorder %v97_v1, %v772_v39  ;;  %v109_v2 = vpop.permute.xlu1 %108 }
  0x98   :  { %v593_v3 = vsel %vm121_vm14, 1.0, %v693_v43  ;;  %vm125_vm15 = vcmp.eq.s32.totalorder %v109_v2, %v772_v39 }
  0x99   :  { %v597_v5 = vsel %vm125_vm15, 1.0, %v693_v43  ;;  %609 = vmatmul.msk.f32.gmra.mxu2 %vm162_vm0, %v593_v3 }
  0x9a   :  { %601 = vmatmul.msk.f32.gmra.mxu0 %vm162_vm0, %v585_v4 }
  0x9b   :  { %613 = vmatmul.msk.f32.gmra.mxu3 %vm162_vm0, %v597_v5 }
  0x9e   :  { %v85_v6 = vpop.permute.xlu0 %84 }
  0x9f   :  { %vm117_vm1 = vcmp.eq.s32.totalorder %v85_v6, %v772_v39 }
  0xa0   :  { %v589_v7 = vsel %vm117_vm1, 1.0, %v693_v43 }
  0xa1   :  { %605 = vmatmul.msk.f32.gmra.mxu1 %vm162_vm0, %v589_v7 }
  0xf7   :  { %v806_v8 = vpop.f32.mrf.mxu0 }
  0xf8   :  { %v276_v9 = vmul.f32 %v806_v8, %v806_v8 }
  0xfa   :  { %292 = vadd.xlane.f32.xlu1 %v276_v9 }
  0xfc   :  { %v810_v10 = vpop.f32.mrf.mxu2 }
  0xfd   :  { %v284_v11 = vmul.f32 %v810_v10, %v810_v10 }
  0xff   :  { %v814_v12 = vpop.f32.mrf.mxu1  ;;  %308 = vadd.xlane.f32.xlu2 %v284_v11 }
 0x100   :  { %v280_v13 = vmul.f32 %v814_v12, %v814_v12 }
 0x102   :  { %300 = vadd.xlane.f32.xlu1 %v280_v13 }
 0x104   :  { %v818_v14 = vpop.f32.mrf.mxu2  ;;  %v820_v15 = vpop.f32.mrf.mxu3 }
 0x105   :  { %v288_v16 = vmul.f32 %v820_v15, %v820_v15  ;;  %v285_v21 = vmul.f32 %v818_v14, %v818_v14 }
 0x106   :  { %v824_v17 = vpop.f32.mrf.mxu0 }
 0x107   :  { %316 = vadd.xlane.f32.xlu0 %v288_v16  ;;  %v277_v18 = vmul.f32 %v824_v17, %v824_v17  ;;  %v828_v19 = vpop.f32.mrf.mxu1 }
 0x108   :  { %v281_v25 = vmul.f32 %v828_v19, %v828_v19 }
 0x109   :  { %294 = vadd.xlane.f32.xlu2 %v277_v18 }
 0x10c   :  { %v830_v20 = vpop.f32.mrf.mxu2 }
 0x10d   :  { %v286_v22 = vmul.f32 %v830_v20, %v830_v20  ;;  %v836_v23 = vpop.f32.mrf.mxu3 }
 0x10e   :  { %v289_v38 = vmul.f32 %v836_v23, %v836_v23 }
 0x10f   :  { %v838_v24 = vpop.f32.mrf.mxu0  ;;  %310 = vadd.xlane.f32.xlu0 %v285_v21  ;;  %312 = vadd.xlane.f32.xlu1 %v286_v22  ;;  %v844_v27 = vpop.f32.mrf.mxu1 }
 0x110   :  { %v278_v26 = vmul.f32 %v838_v24, %v838_v24  ;;  %v282_v32 = vmul.f32 %v844_v27, %v844_v27 }
 0x111   :  { %302 = vadd.xlane.f32.xlu2 %v281_v25 }
 0x116   :  { %v848_v29 = vpop.f32.mrf.mxu3 }
 0x117   :  { %v846_v28 = vpop.f32.mrf.mxu0  ;;  %296 = vadd.xlane.f32.xlu0 %v278_v26  ;;  %v290_v39 = vmul.f32 %v848_v29, %v848_v29 }
 0x118   :  { %v279_v30 = vmul.f32 %v846_v28, %v846_v28 }
 0x11a   :  { %298 = vadd.xlane.f32.xlu2 %v279_v30 }
 0x11c   :  { %v852_v31 = vpop.f32.mrf.mxu2 }
 0x11d   :  { %v287_v35 = vmul.f32 %v852_v31, %v852_v31 }
 0x11e   :  { %v856_v33 = vpop.f32.mrf.mxu1  ;;  %v862_v36 = vpop.f32.mrf.mxu3 }
 0x11f   :  { %v283_v34 = vmul.f32 %v856_v33, %v856_v33  ;;  %304 = vadd.xlane.f32.xlu0 %v282_v32  ;;  %v291_v37 = vmul.f32 %v862_v36, %v862_v36 }
 0x121   :  { %306 = vadd.xlane.f32.xlu1 %v283_v34 }
 0x122   :  { %314 = vadd.xlane.f32.xlu2 %v287_v35 }
 0x127   :  { %322 = vadd.xlane.f32.xlu0 %v291_v37 }
 0x129   :  { %318 = vadd.xlane.f32.xlu1 %v289_v38 }
 0x12a   :  { %320 = vadd.xlane.f32.xlu2 %v290_v39 }
 0x16d   :  { %v293_v40 = vpop.xlane.xlu1 %292 }
 0x16e   :  { %634 = vrsqrt.f32 %v293_v40  ;;  %vm330_vm2 = vweird.f32 %v293_v40  ;;  %vm500_vm5 = vcmp.gt.f32.partialorder %v293_v40, 0.0 }
 0x172   :  { %v309_v41 = vpop.xlane.xlu2 %308 }
 0x173   :  { %636 = vrsqrt.f32 %v309_v41  ;;  %vm410_vm6 = vweird.f32 %v309_v41  ;;  %vm508_vm10 = vcmp.gt.f32.partialorder %v309_v41, 0.0 }
 0x174   :  { %v635_v42 = vpop.eup %634 }
 0x175   :  { %v325_v43 = vmul.f32 %v635_v42, %v293_v40  ;;  %v870_v44 = vpop.xlane.xlu1 %300  ;;  %vm331_vm0 = vweird.f32 %v635_v42 }
 0x176   :  { %638 = vrsqrt.f32 %v870_v44  ;;  %vm332_vm3 = vmor %vm330_vm2, %vm331_vm0  ;;  %vm370_vm9 = vweird.f32 %v870_v44  ;;  %vm504_vm13 = vcmp.gt.f32.partialorder %v870_v44, 0.0 }
 0x177   :  { %v326_v45 = vmul.f32 %v635_v42, %v325_v43 }
 0x179   :  { %v637_v46 = vpop.eup %636  ;;  %v327_v47 = vmul.f32 0.5, %v326_v45 }
 0x17a   :  { %v405_v48 = vmul.f32 %v637_v46, %v309_v41  ;;  %v873_v49 = vpop.xlane.xlu0 %316  ;;  %vm411_vm4 = vweird.f32 %v637_v46 }
 0x17b   :  { %v328_v50 = vsub.f32 1.5, %v327_v47  ;;  %640 = vrsqrt.f32 %v873_v49  ;;  %vm412_vm7 = vmor %vm410_vm6, %vm411_vm4  ;;  %vm450_vm14 = vweird.f32 %v873_v49  ;;  %vm512_vm2 = vcmp.gt.f32.partialorder %v873_v49, 0.0 }
 0x17c   :  { %v639_v51 = vpop.eup %638  ;;  %v406_v52 = vmul.f32 %v637_v46, %v405_v48  ;;  %v876_v53 = vpop.xlane.xlu2 %294 }
 0x17d   :  { %v329_v54 = vmul.f32 %v635_v42, %v328_v50  ;;  %v365_v55 = vmul.f32 %v639_v51, %v870_v44  ;;  %642 = vrsqrt.f32 %v876_v53  ;;  %vm371_vm8 = vweird.f32 %v639_v51 }
 0x17e   :  { %v407_v56 = vmul.f32 0.5, %v406_v52  ;;  %vm372_vm11 = vmor %vm370_vm9, %vm371_vm8  ;;  %vm340_vm0 = vweird.f32 %v876_v53  ;;  %vm501_vm4 = vcmp.gt.f32.partialorder %v876_v53, 0.0 }
 0x17f   :  { %v333_v57 = vsel %vm332_vm3, %v635_v42, %v329_v54  ;;  %v366_v58 = vmul.f32 %v639_v51, %v365_v55 }
 0x180   :  { %v484_v59 = vmin.f32 %v333_v57, 1.0  ;;  %v408_v60 = vsub.f32 1.5, %v407_v56 }
 0x181   :  { %v641_v61 = vpop.eup %640  ;;  %v367_v62 = vmul.f32 0.5, %v366_v58 }
 0x182   :  { %v516_v63 = vsel %vm500_vm5, %v484_v59, 1.0  ;;  %v409_v0 = vmul.f32 %v637_v46, %v408_v60  ;;  %v445_v1 = vmul.f32 %v641_v61, %v873_v49  ;;  %v881_v2 = vpop.xlane.xlu0 %310  ;;  %v883_v3 = vpop.xlane.xlu1 %312  ;;  %vm451_vm12 = vweird.f32 %v641_v61 }
 0x183   :  { %v643_v4 = vpop.eup %642  ;;  %v532_v5 = vmul.f32 %v516_v63, %v806_v8  ;;  %v368_v6 = vsub.f32 1.5, %v367_v62  ;;  %644 = vrsqrt.f32 %v881_v2  ;;  %vm452_vm1 = vmor %vm450_vm14, %vm451_vm12  ;;  %vm420_vm6 = vweird.f32 %v881_v2 }
 0x184   :  { %v413_v7 = vsel %vm412_vm7, %v637_v46, %v409_v0  ;;  %v446_v9 = vmul.f32 %v641_v61, %v445_v1  ;;  %v335_v11 = vmul.f32 %v643_v4, %v876_v53  ;;  %v888_v13 = vpop.xlane.xlu2 %302  ;;  %646 = vrsqrt.f32 %v883_v3 }
 0x185   :  { %548 = vst [vmem:[#allocation2] sm:$0xff] %v532_v5  ;;  %v492_v16 = vmin.f32 %v413_v7, 1.0  ;;  %v369_v18 = vmul.f32 %v639_v51, %v368_v6  ;;  %648 = vrsqrt.f32 %v888_v13  ;;  %vm341_vm15 = vweird.f32 %v643_v4 }
 0x186   :  { %v447_v8 = vmul.f32 0.5, %v446_v9  ;;  %v336_v21 = vmul.f32 %v643_v4, %v335_v11  ;;  %vm342_vm3 = vmor %vm340_vm0, %vm341_vm15  ;;  %vm509_vm9 = vcmp.gt.f32.partialorder %v881_v2, 0.0  ;;  %vm380_vm14 = vweird.f32 %v888_v13 }
 0x187   :  { %v524_v22 = vsel %vm508_vm10, %v492_v16, 1.0  ;;  %v373_v25 = vsel %vm372_vm11, %v639_v51, %v369_v18  ;;  %vm430_vm10 = vweird.f32 %v883_v3 }
 0x188   :  { %v540_v26 = vmul.f32 %v524_v22, %v810_v10  ;;  %v488_v30 = vmin.f32 %v373_v25, 1.0  ;;  %v448_v32 = vsub.f32 1.5, %v447_v8  ;;  %v337_v34 = vmul.f32 0.5, %v336_v21 }
 0x189   :  { %v645_v35 = vpop.eup %644 }
 0x18a   :  { %556 = vst [vmem:[#allocation2 + $0x40] sm:$0xff] %v540_v26  ;;  %v520_v37 = vsel %vm504_vm13, %v488_v30, 1.0  ;;  %v449_v38 = vmul.f32 %v641_v61, %v448_v32  ;;  %v338_v39 = vsub.f32 1.5, %v337_v34  ;;  %v415_v40 = vmul.f32 %v645_v35, %v881_v2  ;;  %v897_v41 = vpop.xlane.xlu0 %296  ;;  %v647_v42 = vpop.eup %646 }
 0x18b   :  { %v536_v10 = vmul.f32 %v520_v37, %v814_v12  ;;  %650 = vrsqrt.f32 %v897_v41  ;;  %v425_v46 = vmul.f32 %v647_v42, %v883_v3  ;;  %v649_v47 = vpop.eup %648  ;;  %vm421_vm5 = vweird.f32 %v645_v35 }
 0x18c   :  { %v453_v43 = vsel %vm452_vm1, %v641_v61, %v449_v38  ;;  %v339_v44 = vmul.f32 %v643_v4, %v338_v39  ;;  %v416_v45 = vmul.f32 %v645_v35, %v415_v40  ;;  %v375_v54 = vmul.f32 %v649_v47, %v888_v13  ;;  %vm422_vm8 = vmor %vm420_vm6, %vm421_vm5 }
 0x18d   :  { %552 = vst [vmem:[#allocation2 + $0x20] sm:$0xff] %v536_v10  ;;  %v496_v48 = vmin.f32 %v453_v43, 1.0  ;;  %v907_v12 = vpop.xlane.xlu2 %298  ;;  %v426_v52 = vmul.f32 %v647_v42, %v425_v46  ;;  %vm431_vm7 = vweird.f32 %v647_v42  ;;  %vm381_vm11 = vweird.f32 %v649_v47 }
 0x18e   :  { %v343_v50 = vsel %vm342_vm3, %v643_v4, %v339_v44  ;;  %v417_v51 = vmul.f32 0.5, %v416_v45  ;;  %652 = vrsqrt.f32 %v907_v12  ;;  %v376_v59 = vmul.f32 %v649_v47, %v375_v54  ;;  %vm432_vm12 = vmor %vm430_vm10, %vm431_vm7 }
 0x18f   :  { %v528_v55 = vsel %vm512_vm2, %v496_v48, 1.0  ;;  %v485_v56 = vmin.f32 %v343_v50, 1.0  ;;  %v427_v49 = vmul.f32 0.5, %v426_v52  ;;  %vm510_vm13 = vcmp.gt.f32.partialorder %v883_v3, 0.0  ;;  %vm382_vm15 = vmor %vm380_vm14, %vm381_vm11 }
 0x190   :  { %v544_v57 = vmul.f32 %v528_v55, %v820_v15  ;;  %v418_v58 = vsub.f32 1.5, %v417_v51  ;;  %v377_v0 = vmul.f32 0.5, %v376_v59  ;;  %vm505_vm1 = vcmp.gt.f32.partialorder %v888_v13, 0.0 }
 0x191   :  { %v912_v60 = vpop.eup %650  ;;  %v517_v53 = vsel %vm501_vm4, %v485_v56, 1.0  ;;  %v428_v63 = vsub.f32 1.5, %v427_v49  ;;  %vm350_vm2 = vweird.f32 %v897_v41  ;;  %vm502_vm5 = vcmp.gt.f32.partialorder %v897_v41, 0.0 }
 0x192   :  { %560 = vst [vmem:[#allocation2 + $0x60] sm:$0xff] %v544_v57  ;;  %v533_v61 = vmul.f32 %v517_v53, %v824_v17  ;;  %v419_v62 = vmul.f32 %v645_v35, %v418_v58  ;;  %v916_v1 = vpop.xlane.xlu0 %304  ;;  %v345_v15 = vmul.f32 %v912_v60, %v897_v41  ;;  %v378_v17 = vsub.f32 1.5, %v377_v0 }
 0x193   :  { %654 = vrsqrt.f32 %v916_v1  ;;  %v429_v5 = vmul.f32 %v647_v42, %v428_v63  ;;  %vm351_vm0 = vweird.f32 %v912_v60  ;;  %vm360_vm6 = vweird.f32 %v907_v12 }
 0x194   :  { %549 = vst [vmem:[#allocation2 + $0x8] sm:$0xff] %v533_v61  ;;  %v423_v4 = vsel %vm422_vm8, %v645_v35, %v419_v62  ;;  %v924_v6 = vpop.xlane.xlu1 %306  ;;  %v926_v7 = vpop.eup %652  ;;  %v346_v11 = vmul.f32 %v912_v60, %v345_v15  ;;  %v379_v8 = vmul.f32 %v649_v47, %v378_v17  ;;  %vm352_vm4 = vmor %vm350_vm2, %vm351_vm0  ;;  %vm503_vm8 = vcmp.gt.f32.partialorder %v907_v12, 0.0 }
 0x195   :  { %v493_v9 = vmin.f32 %v423_v4, 1.0  ;;  %v931_v16 = vpop.xlane.xlu2 %314  ;;  %656 = vrsqrt.f32 %v924_v6  ;;  %v433_v18 = vsel %vm432_vm12, %v647_v42, %v429_v5  ;;  %v355_v21 = vmul.f32 %v926_v7, %v907_v12 }
 0x196   :  { %v494_v25 = vmin.f32 %v433_v18, 1.0  ;;  %v347_v26 = vmul.f32 0.5, %v346_v11  ;;  %658 = vrsqrt.f32 %v931_v16  ;;  %v383_v32 = vsel %vm382_vm15, %v649_v47, %v379_v8 }
 0x197   :  { %v525_v22 = vsel %vm509_vm9, %v493_v9, 1.0  ;;  %v356_v34 = vmul.f32 %v926_v7, %v355_v21  ;;  %v489_v38 = vmin.f32 %v383_v32, 1.0  ;;  %vm361_vm3 = vweird.f32 %v926_v7 }
 0x198   :  { %v541_v30 = vmul.f32 %v525_v22, %v818_v14  ;;  %v526_v37 = vsel %vm510_vm13, %v494_v25, 1.0  ;;  %v348_v2 = vsub.f32 1.5, %v347_v26  ;;  %vm362_vm7 = vmor %vm360_vm6, %vm361_vm3  ;;  %vm390_vm10 = vweird.f32 %v916_v1 }
 0x199   :  { %v655_v35 = vpop.eup %654  ;;  %v542_v39 = vmul.f32 %v526_v37, %v830_v20  ;;  %v357_v40 = vmul.f32 0.5, %v356_v34  ;;  %v521_v10 = vsel %vm505_vm1, %v489_v38, 1.0  ;;  %vm506_vm14 = vcmp.gt.f32.partialorder %v916_v1, 0.0 }
 0x19a   :  { %557 = vst [vmem:[#allocation2 + $0x48] sm:$0xff] %v541_v30  ;;  %v385_v14 = vmul.f32 %v655_v35, %v916_v1  ;;  %v950_v42 = vpop.xlane.xlu0 %322  ;;  %v349_v3 = vmul.f32 %v912_v60, %v348_v2  ;;  %v537_v43 = vmul.f32 %v521_v10, %v828_v19  ;;  %vm391_vm9 = vweird.f32 %v655_v35 }
 0x19b   :  { %v952_v13 = vpop.eup %656  ;;  %660 = vrsqrt.f32 %v950_v42  ;;  %558 = vst [vmem:[#allocation2 + $0x50] sm:$0xff] %v542_v39  ;;  %v358_v20 = vsub.f32 1.5, %v357_v40  ;;  %vm392_vm12 = vmor %vm390_vm10, %vm391_vm9  ;;  %vm400_vm15 = vweird.f32 %v924_v6  ;;  %vm440_vm1 = vweird.f32 %v931_v16 }
 0x19c   :  { %v386_v44 = vmul.f32 %v655_v35, %v385_v14  ;;  %v395_v45 = vmul.f32 %v952_v13, %v924_v6  ;;  %v659_v46 = vpop.eup %658  ;;  %v353_v47 = vsel %vm352_vm4, %v912_v60, %v349_v3  ;;  %553 = vst [vmem:[#allocation2 + $0x28] sm:$0xff] %v537_v43  ;;  %v973_v58 = vpop.xlane.xlu1 %318  ;;  %vm401_vm11 = vweird.f32 %v952_v13 }
 0x19d   :  { %v963_v48 = vpop.xlane.xlu2 %320  ;;  %v486_v50 = vmin.f32 %v353_v47, 1.0  ;;  %v359_v51 = vmul.f32 %v926_v7, %v358_v20  ;;  %v435_v52 = vmul.f32 %v659_v46, %v931_v16  ;;  %vm441_vm13 = vweird.f32 %v659_v46  ;;  %vm402_vm0 = vmor %vm400_vm15, %vm401_vm11 }
 0x19e   :  { %v387_v19 = vmul.f32 0.5, %v386_v44  ;;  %v396_v54 = vmul.f32 %v952_v13, %v395_v45  ;;  %662 = vrsqrt.f32 %v963_v48  ;;  %vm442_vm2 = vmor %vm440_vm1, %vm441_vm13  ;;  %vm511_vm4 = vcmp.gt.f32.partialorder %v931_v16, 0.0 }
 0x19f   :  { %v518_v41 = vsel %vm502_vm5, %v486_v50, 1.0  ;;  %v363_v55 = vsel %vm362_vm7, %v926_v7, %v359_v51  ;;  %v436_v57 = vmul.f32 %v659_v46, %v435_v52  ;;  %664 = vrsqrt.f32 %v973_v58 }
 0x1a0   :  { %v388_v56 = vsub.f32 1.5, %v387_v19  ;;  %v534_v59 = vmul.f32 %v518_v41, %v838_v24  ;;  %v487_v60 = vmin.f32 %v363_v55, 1.0  ;;  %v397_v53 = vmul.f32 0.5, %v396_v54 }
 0x1a1   :  { %v661_v49 = vpop.eup %660  ;;  %v437_v62 = vmul.f32 0.5, %v436_v57  ;;  %vm507_vm5 = vcmp.gt.f32.partialorder %v924_v6, 0.0  ;;  %vm480_vm6 = vweird.f32 %v950_v42  ;;  %vm515_vm9 = vcmp.gt.f32.partialorder %v950_v42, 0.0 }
 0x1a2   :  { %v389_v61 = vmul.f32 %v655_v35, %v388_v56  ;;  %v475_v63 = vmul.f32 %v661_v49, %v950_v42  ;;  %550 = vst [vmem:[#allocation2 + $0x10] sm:$0xff] %v534_v59  ;;  %v519_v0 = vsel %vm503_vm8, %v487_v60, 1.0  ;;  %v398_v15 = vsub.f32 1.5, %v397_v53 }
 0x1a3   :  { %v535_v24 = vmul.f32 %v519_v0, %v846_v28  ;;  %v438_v5 = vsub.f32 1.5, %v437_v62  ;;  %vm481_vm3 = vweird.f32 %v661_v49  ;;  %vm470_vm10 = vweird.f32 %v963_v48 }
 0x1a4   :  { %v393_v4 = vsel %vm392_vm12, %v655_v35, %v389_v61  ;;  %v476_v17 = vmul.f32 %v661_v49, %v475_v63  ;;  %v663_v7 = vpop.eup %662  ;;  %v399_v11 = vmul.f32 %v952_v13, %v398_v15  ;;  %vm482_vm7 = vmor %vm480_vm6, %vm481_vm3  ;;  %vm460_vm13 = vweird.f32 %v973_v58 }
 0x1a5   :  { %v490_v9 = vmin.f32 %v393_v4, 1.0  ;;  %551 = vst [vmem:[#allocation2 + $0x18] sm:$0xff] %v535_v24  ;;  %v439_v12 = vmul.f32 %v659_v46, %v438_v5  ;;  %v465_v28 = vmul.f32 %v663_v7, %v963_v48  ;;  %v665_v30 = vpop.eup %664  ;;  %vm471_vm8 = vweird.f32 %v663_v7 }
 0x1a6   :  { %v477_v18 = vmul.f32 0.5, %v476_v17  ;;  %v403_v21 = vsel %vm402_vm0, %v952_v13, %v399_v11  ;;  %v455_v38 = vmul.f32 %v665_v30, %v973_v58  ;;  %vm472_vm11 = vmor %vm470_vm10, %vm471_vm8  ;;  %vm461_vm12 = vweird.f32 %v665_v30 }
 0x1a7   :  { %v522_v8 = vsel %vm506_vm14, %v490_v9, 1.0  ;;  %v443_v22 = vsel %vm442_vm2, %v659_v46, %v439_v12  ;;  %v491_v25 = vmin.f32 %v403_v21, 1.0  ;;  %v466_v34 = vmul.f32 %v663_v7, %v465_v28  ;;  %vm462_vm15 = vmor %vm460_vm13, %vm461_vm12 }
 0x1a8   :  { %v538_v1 = vmul.f32 %v522_v8, %v844_v27  ;;  %v478_v26 = vsub.f32 1.5, %v477_v18  ;;  %v495_v32 = vmin.f32 %v443_v22, 1.0  ;;  %v456_v16 = vmul.f32 %v665_v30, %v455_v38 }
 0x1a9   :  { %v523_v35 = vsel %vm507_vm5, %v491_v25, 1.0  ;;  %v467_v39 = vmul.f32 0.5, %v466_v34  ;;  %vm514_vm14 = vcmp.gt.f32.partialorder %v963_v48, 0.0  ;;  %vm513_vm1 = vcmp.gt.f32.partialorder %v973_v58, 0.0 }
 0x1aa   :  { %554 = vst [vmem:[#allocation2 + $0x30] sm:$0xff] %v538_v1  ;;  %v479_v37 = vmul.f32 %v661_v49, %v478_v26  ;;  %v527_v2 = vsel %vm511_vm4, %v495_v32, 1.0  ;;  %v539_v27 = vmul.f32 %v523_v35, %v856_v33  ;;  %v457_v10 = vmul.f32 0.5, %v456_v16 }
 0x1ab   :  { %v543_v40 = vmul.f32 %v527_v2, %v852_v31  ;;  %v468_v13 = vsub.f32 1.5, %v467_v39 }
 0x1ac   :  { %v483_v14 = vsel %vm482_vm7, %v661_v49, %v479_v37  ;;  %555 = vst [vmem:[#allocation2 + $0x38] sm:$0xff] %v539_v27  ;;  %v458_v20 = vsub.f32 1.5, %v457_v10 }
 0x1ad   :  { %v499_v6 = vmin.f32 %v483_v14, 1.0  ;;  %559 = vst [vmem:[#allocation2 + $0x58] sm:$0xff] %v543_v40  ;;  %v469_v43 = vmul.f32 %v663_v7, %v468_v13 }
 0x1ae   :  { %v459_v45 = vmul.f32 %v665_v30, %v458_v20 }
 0x1af   :  { %v531_v3 = vsel %vm515_vm9, %v499_v6, 1.0  ;;  %v473_v31 = vsel %vm472_vm11, %v663_v7, %v469_v43 }
 0x1b0   :  { %v547_v33 = vmul.f32 %v531_v3, %v862_v36  ;;  %v498_v44 = vmin.f32 %v473_v31, 1.0  ;;  %v463_v46 = vsel %vm462_vm15, %v665_v30, %v459_v45 }
 0x1b1   :  { %v497_v47 = vmin.f32 %v463_v46, 1.0 }
 0x1b2   :  { %563 = vst [vmem:[#allocation2 + $0x78] sm:$0xff] %v547_v33  ;;  %v530_v42 = vsel %vm514_vm14, %v498_v44, 1.0 }
 0x1b3   :  { %v546_v36 = vmul.f32 %v530_v42, %v848_v29  ;;  %v529_v50 = vsel %vm513_vm1, %v497_v47, 1.0 }
 0x1b4   :  { %v545_v48 = vmul.f32 %v529_v50, %v836_v23 }
 0x1b5   :  { %562 = vst [vmem:[#allocation2 + $0x70] sm:$0xff] %v546_v36 }
 0x1b6   :  { %561 = vst [vmem:[#allocation2 + $0x68] sm:$0xff] %v545_v48 }
 0x1b7   :  { %576 = dma.vmem_to_hbm [thread:$0]  %s569_s20, 2048, %s571_s23, [#allocation3], %s695_s24, %s695_s24, %s696_s25  }
 0x1b8   :  { %690 = dma.done.wait [#allocation3], 2048  }
 0x1b9   :  { %691 = vsyncadd [#allocation3], 4294965248 }
 0x1ba   :  { %581 = vsyncpa [#allocation3], 1 }

// kernel: tpu_custom_call.1
= control target key start
LH: loop header
LB: loop body
LE: loop exit
PB: predicated region body
PF: predicated region fallthrough
CT: control target
= control target key end

     0   :  { %v692_v3 = vmov 0   ;;  %s1012_s0 = inlined_call_operand.vmem [shape: s32[128,1], index: 0, kind: input, shape index: {}]   ;;  %s1013_s1 = inlined_call_operand.vmem [shape: f32[32,128], index: 1, kind: input, shape index: {}]   ;;  %s1014_s2 = inlined_call_operand.hbm [shape: f32[128,128], index: 2, kind: output, shape index: {}]  }
   0x1   :  { %v21_v0 = vld [vmem:[%s1012_s0 + $0x48] sm:$0xff]  ;;  %v20_v1 = vld [vmem:[%s1012_s0 + $0x40] sm:$0xff]  ;;  %633 = vset.pattern.permute.xlu2 %v692_v3  ;;  %632 = vset.pattern.permute.xlu1 %v692_v3 }
   0x2   :  { %v12_v2 = vld [vmem:[%s1012_s0] sm:$0xff]  ;;  %vm37_vm0 = vcmp.eq.s32.totalorder %v21_v0, 0  ;;  %vm36_vm1 = vcmp.eq.s32.totalorder %v20_v1, 0  ;;  %631 = vset.pattern.permute.xlu0 %v692_v3  ;;  %v25_v7 = vld [vmem:[%s1012_s0 + $0x68] sm:$0xff] }
   0x3   :  { %vm28_vm2 = vcmp.eq.s32.totalorder %v12_v2, 0  ;;  %v53_v4 = vsel %vm37_vm0, 4294967295, %v21_v0  ;;  %v52_v5 = vsel %vm36_vm1, 4294967295, %v20_v1  ;;  %v24_v8 = vld [vmem:[%s1012_s0 + $0x60] sm:$0xff]  ;;  %vm41_vm3 = vcmp.eq.s32.totalorder %v25_v7, 0 }
   0x4   :  { %v44_v6 = vsel %vm28_vm2, 4294967295, %v12_v2  ;;  %90 = vperm.xlu2 %633, %v53_v4   ;;  %87 = vperm.xlu0 %631, %v52_v5   ;;  %v16_v9 = vld [vmem:[%s1012_s0 + $0x20] sm:$0xff]  ;;  %vm40_vm4 = vcmp.eq.s32.totalorder %v24_v8, 0 }
   0x5   :  { %63 = vperm.xlu1 %632, %v44_v6   ;;  %vm32_vm5 = vcmp.eq.s32.totalorder %v16_v9, 0 }
   0x6   :  { %7 = vsyncpa [#allocation3], 0  ;;  %v57_v10 = vsel %vm41_vm3, 4294967295, %v25_v7  ;;  %v56_v11 = vsel %vm40_vm4, 4294967295, %v24_v8  ;;  %v48_v12 = vsel %vm32_vm5, 4294967295, %v16_v9  ;;  %v22_v13 = vld [vmem:[%s1012_s0 + $0x50] sm:$0xff]  ;;  %v60_v38 = vlaneseq }
   0x7   :  { %v13_v14 = vld [vmem:[%s1012_s0 + $0x8] sm:$0xff]  ;;  %vm38_vm6 = vcmp.eq.s32.totalorder %v22_v13, 0  ;;  %v18_v19 = vld [vmem:[%s1012_s0 + $0x30] sm:$0xff]  ;;  %v15_v25 = vld [vmem:[%s1012_s0 + $0x18] sm:$0xff]  ;;  %vm162_vm0 = vcmask 261120   ;;  %v693_v43 = vmov 0.0  }
   0x8   :  { %v17_v15 = vld [vmem:[%s1012_s0 + $0x28] sm:$0xff]  ;;  %vm29_vm7 = vcmp.eq.s32.totalorder %v13_v14, 0  ;;  %v54_v16 = vsel %vm38_vm6, 4294967295, %v22_v13  ;;  %v26_v20 = vld [vmem:[%s1012_s0 + $0x70] sm:$0xff]  ;;  %vm34_vm9 = vcmp.eq.s32.totalorder %v18_v19, 0  ;;  %v23_v26 = vld [vmem:[%s1012_s0 + $0x58] sm:$0xff] }
   0x9   :  { %vm33_vm8 = vcmp.eq.s32.totalorder %v17_v15, 0  ;;  %v45_v17 = vsel %vm29_vm7, 4294967295, %v13_v14  ;;  %v14_v21 = vld [vmem:[%s1012_s0 + $0x10] sm:$0xff]  ;;  %vm42_vm10 = vcmp.eq.s32.totalorder %v26_v20, 0  ;;  %v50_v22 = vsel %vm34_vm9, 4294967295, %v18_v19  ;;  %v27_v27 = vld [vmem:[%s1012_s0 + $0x78] sm:$0xff] }
   0xa   :  { %v49_v18 = vsel %vm33_vm8, 4294967295, %v17_v15  ;;  %vm30_vm11 = vcmp.eq.s32.totalorder %v14_v21, 0  ;;  %v58_v23 = vsel %vm42_vm10, 4294967295, %v26_v20  ;;  %vm31_vm12 = vcmp.eq.s32.totalorder %v15_v25, 0  ;;  %v19_v31 = vld [vmem:[%s1012_s0 + $0x38] sm:$0xff]  ;;  %v160_v34 = vld [vmem:[%s1013_s1 + $0x10] sm:$0xff] }
   0xb   :  { %v46_v24 = vsel %vm30_vm11, 4294967295, %v14_v21  ;;  %vm39_vm13 = vcmp.eq.s32.totalorder %v23_v26, 0  ;;  %vm43_vm14 = vcmp.eq.s32.totalorder %v27_v27, 0  ;;  %v47_v28 = vsel %vm31_vm12, 4294967295, %v15_v25  ;;  %v161_v33 = vld [vmem:[%s1013_s1 + $0x18] sm:$0xff]  ;;  %v159_v35 = vld [vmem:[%s1013_s1 + $0x8] sm:$0xff] }
   0xc   :  { %102 = vperm.xlu2 %633, %v57_v10   ;;  %99 = vperm.xlu0 %631, %v56_v11   ;;  %v55_v29 = vsel %vm39_vm13, 4294967295, %v23_v26  ;;  %v59_v30 = vsel %vm43_vm14, 4294967295, %v27_v27  ;;  %vm35_vm15 = vcmp.eq.s32.totalorder %v19_v31, 0  ;;  %v158_v36 = vld [vmem:[%s1013_s1] sm:$0xff]  ;;  %v772_v39 = vand.u32 127, %v60_v38  ;;  %s694_s1 = smov [#allocation2]  }
   0xd   :  { %75 = vperm.xlu1 %632, %v48_v12   ;;  %v51_v32 = vsel %vm35_vm15, 4294967295, %v19_v31  ;;  %223 = vmatpush.msra.mxu0 %v161_v33  ;;  %s568_s20 = sshll.u32 %s694_s1, 4  ;;  %s570_s23 = sshll.u32 %s1014_s2, 4  ;;  %s569_s20 = int_to_ptr.vmem [resolvable:$true] %s568_s20  ;;  %s571_s23 = int_to_ptr.hbm [resolvable:$true] %s570_s23 }
   0xe   :  { %615 = vmatpush.msra.mxu2 %v161_v33  ;;  %614 = vmatpush.msra.mxu1 %v161_v33  ;;  %s695_s24 = smov 128   ;;  %s696_s25 = smov 8  }
   0xf   :  { %616 = vmatpush.msra.mxu3 %v161_v33  ;;  %224 = vmatpush.msra.mxu0 %v160_v34 }
  0x10   :  { %618 = vmatpush.msra.mxu2 %v160_v34  ;;  %617 = vmatpush.msra.mxu1 %v160_v34 }
  0x11   :  { %619 = vmatpush.msra.mxu3 %v160_v34  ;;  %225 = vmatpush.msra.mxu0 %v159_v35 }
  0x12   :  { %621 = vmatpush.msra.mxu2 %v159_v35  ;;  %620 = vmatpush.msra.mxu1 %v159_v35 }
  0x13   :  { %622 = vmatpush.msra.mxu3 %v159_v35  ;;  %226 = vmatpush.msra.mxu0 %v158_v36 }
  0x14   :  { %93 = vperm.xlu2 %633, %v54_v16   ;;  %66 = vperm.xlu0 %631, %v45_v17  }
  0x15   :  { %78 = vperm.xlu1 %632, %v49_v18   ;;  %624 = vmatpush.msra.mxu2 %v158_v36 }
  0x16   :  { %623 = vmatpush.msra.mxu1 %v158_v36  ;;  %625 = vmatpush.msra.mxu3 %v158_v36 }
  0x1c   :  { %81 = vperm.xlu2 %633, %v50_v22   ;;  %105 = vperm.xlu0 %631, %v58_v23  }
  0x1d   :  { %69 = vperm.xlu1 %632, %v46_v24  }
  0x24   :  { %72 = vperm.xlu2 %633, %v47_v28   ;;  %96 = vperm.xlu0 %631, %v55_v29  }
  0x25   :  { %108 = vperm.xlu1 %632, %v59_v30  }
  0x2c   :  { %84 = vperm.xlu0 %631, %v51_v32  }
  0x5e   :  { %v91_v37 = vpop.permute.xlu2 %90 }
  0x5f   :  { %vm119_vm3 = vcmp.eq.s32.totalorder %v91_v37, %v772_v39 }
  0x60   :  { %v591_v49 = vsel %vm119_vm3, 1.0, %v693_v43 }
  0x66   :  { %v103_v40 = vpop.permute.xlu2 %102 }
  0x67   :  { %vm123_vm7 = vcmp.eq.s32.totalorder %v103_v40, %v772_v39 }
  0x68   :  { %v595_v56 = vsel %vm123_vm7, 1.0, %v693_v43 }
  0x6e   :  { %v94_v47 = vpop.permute.xlu2 %93 }
  0x6f   :  { %vm120_vm6 = vcmp.eq.s32.totalorder %v94_v47, %v772_v39 }
  0x70   :  { %v592_v54 = vsel %vm120_vm6, 1.0, %v693_v43 }
  0x76   :  { %v88_v41 = vpop.permute.xlu0 %87  ;;  %v82_v57 = vpop.permute.xlu2 %81 }
  0x77   :  { %vm118_vm1 = vcmp.eq.s32.totalorder %v88_v41, %v772_v39  ;;  %v64_v42 = vpop.permute.xlu1 %63  ;;  %vm116_vm10 = vcmp.eq.s32.totalorder %v82_v57, %v772_v39 }
  0x78   :  { %v590_v44 = vsel %vm118_vm1, 1.0, %v693_v43  ;;  %vm110_vm2 = vcmp.eq.s32.totalorder %v64_v42, %v772_v39  ;;  %v588_v62 = vsel %vm116_vm10, 1.0, %v693_v43 }
  0x79   :  { %v582_v45 = vsel %vm110_vm2, 1.0, %v693_v43  ;;  %606 = vmatmul.msk.f32.vlgmr.msra.gmra.mxu2 %vm162_vm0, %v590_v44 }
  0x7a   :  { %598 = vmatmul.msk.f32.vlgmr.msra.gmra.mxu0 %vm162_vm0, %v582_v45 }
  0x7e   :  { %v100_v46 = vpop.permute.xlu0 %99  ;;  %v73_v0 = vpop.permute.xlu2 %72 }
  0x7f   :  { %vm122_vm4 = vcmp.eq.s32.totalorder %v100_v46, %v772_v39  ;;  %v76_v48 = vpop.permute.xlu1 %75  ;;  %vm113_vm13 = vcmp.eq.s32.totalorder %v73_v0, %v772_v39 }
  0x80   :  { %v594_v50 = vsel %vm122_vm4, 1.0, %v693_v43  ;;  %vm114_vm5 = vcmp.eq.s32.totalorder %v76_v48, %v772_v39  ;;  %v585_v4 = vsel %vm113_vm13, 1.0, %v693_v43 }
  0x81   :  { %v586_v51 = vsel %vm114_vm5, 1.0, %v693_v43  ;;  %607 = vmatmul.msk.f32.gmra.mxu2 %vm162_vm0, %v591_v49  ;;  %610 = vmatmul.msk.f32.vlgmr.msra.gmra.mxu3 %vm162_vm0, %v594_v50 }
  0x82   :  { %602 = vmatmul.msk.f32.vlgmr.msra.gmra.mxu1 %vm162_vm0, %v586_v51 }
  0x86   :  { %v67_v52 = vpop.permute.xlu0 %66 }
  0x87   :  { %vm111_vm8 = vcmp.eq.s32.totalorder %v67_v52, %v772_v39  ;;  %v79_v53 = vpop.permute.xlu1 %78 }
  0x88   :  { %v583_v55 = vsel %vm111_vm8, 1.0, %v693_v43  ;;  %vm115_vm9 = vcmp.eq.s32.totalorder %v79_v53, %v772_v39 }
  0x89   :  { %v587_v58 = vsel %vm115_vm9, 1.0, %v693_v43  ;;  %599 = vmatmul.msk.f32.gmra.mxu0 %vm162_vm0, %v583_v55  ;;  %608 = vmatmul.msk.f32.gmra.mxu2 %vm162_vm0, %v592_v54 }
  0x8a   :  { %603 = vmatmul.msk.f32.gmra.mxu1 %vm162_vm0, %v587_v58  ;;  %611 = vmatmul.msk.f32.gmra.mxu3 %vm162_vm0, %v595_v56 }
  0x8e   :  { %v106_v59 = vpop.permute.xlu0 %105 }
  0x8f   :  { %vm124_vm11 = vcmp.eq.s32.totalorder %v106_v59, %v772_v39  ;;  %v70_v60 = vpop.permute.xlu1 %69 }
  0x90   :  { %v596_v61 = vsel %vm124_vm11, 1.0, %v693_v43  ;;  %vm112_vm12 = vcmp.eq.s32.totalorder %v70_v60, %v772_v39 }
  0x91   :  { %v584_v63 = vsel %vm112_vm12, 1.0, %v693_v43 }
  0x92   :  { %600 = vmatmul.msk.f32.gmra.mxu0 %vm162_vm0, %v584_v63  ;;  %604 = vmatmul.msk.f32.gmra.mxu1 %vm162_vm0, %v588_v62 }
  0x93   :  { %612 = vmatmul.msk.f32.gmra.mxu3 %vm162_vm0, %v596_v61 }
  0x96   :  { %v97_v1 = vpop.permute.xlu0 %96 }
  0x97   :  { %vm121_vm14 = vcmp.eq.s32.totalorder %v97_v1, %v772_v39  ;;  %v109_v2 = vpop.permute.xlu1 %108 }
  0x98   :  { %v593_v3 = vsel %vm121_vm14, 1.0, %v693_v43  ;;  %vm125_vm15 = vcmp.eq.s32.totalorder %v109_v2, %v772_v39 }
  0x99   :  { %v597_v5 = vsel %vm125_vm15, 1.0, %v693_v43  ;;  %609 = vmatmul.msk.f32.gmra.mxu2 %vm162_vm0, %v593_v3 }
  0x9a   :  { %601 = vmatmul.msk.f32.gmra.mxu0 %vm162_vm0, %v585_v4 }
  0x9b   :  { %613 = vmatmul.msk.f32.gmra.mxu3 %vm162_vm0, %v597_v5 }
  0x9e   :  { %v85_v6 = vpop.permute.xlu0 %84 }
  0x9f   :  { %vm117_vm1 = vcmp.eq.s32.totalorder %v85_v6, %v772_v39 }
  0xa0   :  { %v589_v7 = vsel %vm117_vm1, 1.0, %v693_v43 }
  0xa1   :  { %605 = vmatmul.msk.f32.gmra.mxu1 %vm162_vm0, %v589_v7 }
  0xf7   :  { %v806_v8 = vpop.f32.mrf.mxu0 }
  0xf8   :  { %v276_v9 = vmul.f32 %v806_v8, %v806_v8 }
  0xfa   :  { %292 = vadd.xlane.f32.xlu1 %v276_v9 }
  0xfc   :  { %v810_v10 = vpop.f32.mrf.mxu2 }
  0xfd   :  { %v284_v11 = vmul.f32 %v810_v10, %v810_v10 }
  0xff   :  { %v814_v12 = vpop.f32.mrf.mxu1  ;;  %308 = vadd.xlane.f32.xlu2 %v284_v11 }
 0x100   :  { %v280_v13 = vmul.f32 %v814_v12, %v814_v12 }
 0x102   :  { %300 = vadd.xlane.f32.xlu1 %v280_v13 }
 0x104   :  { %v818_v14 = vpop.f32.mrf.mxu2  ;;  %v820_v15 = vpop.f32.mrf.mxu3 }
 0x105   :  { %v288_v16 = vmul.f32 %v820_v15, %v820_v15  ;;  %v285_v21 = vmul.f32 %v818_v14, %v818_v14 }
 0x106   :  { %v824_v17 = vpop.f32.mrf.mxu0 }
 0x107   :  { %316 = vadd.xlane.f32.xlu0 %v288_v16  ;;  %v277_v18 = vmul.f32 %v824_v17, %v824_v17  ;;  %v828_v19 = vpop.f32.mrf.mxu1 }
 0x108   :  { %v281_v25 = vmul.f32 %v828_v19, %v828_v19 }
 0x109   :  { %294 = vadd.xlane.f32.xlu2 %v277_v18 }
 0x10c   :  { %v830_v20 = vpop.f32.mrf.mxu2 }
 0x10d   :  { %v286_v22 = vmul.f32 %v830_v20, %v830_v20  ;;  %v836_v23 = vpop.f32.mrf.mxu3 }
 0x10e   :  { %v289_v38 = vmul.f32 %v836_v23, %v836_v23 }
 0x10f   :  { %v838_v24 = vpop.f32.mrf.mxu0  ;;  %310 = vadd.xlane.f32.xlu0 %v285_v21  ;;  %312 = vadd.xlane.f32.xlu1 %v286_v22  ;;  %v844_v27 = vpop.f32.mrf.mxu1 }
 0x110   :  { %v278_v26 = vmul.f32 %v838_v24, %v838_v24  ;;  %v282_v32 = vmul.f32 %v844_v27, %v844_v27 }
 0x111   :  { %302 = vadd.xlane.f32.xlu2 %v281_v25 }
 0x116   :  { %v848_v29 = vpop.f32.mrf.mxu3 }
 0x117   :  { %v846_v28 = vpop.f32.mrf.mxu0  ;;  %296 = vadd.xlane.f32.xlu0 %v278_v26  ;;  %v290_v39 = vmul.f32 %v848_v29, %v848_v29 }
 0x118   :  { %v279_v30 = vmul.f32 %v846_v28, %v846_v28 }
 0x11a   :  { %298 = vadd.xlane.f32.xlu2 %v279_v30 }
 0x11c   :  { %v852_v31 = vpop.f32.mrf.mxu2 }
 0x11d   :  { %v287_v35 = vmul.f32 %v852_v31, %v852_v31 }
 0x11e   :  { %v856_v33 = vpop.f32.mrf.mxu1  ;;  %v862_v36 = vpop.f32.mrf.mxu3 }
 0x11f   :  { %v283_v34 = vmul.f32 %v856_v33, %v856_v33  ;;  %304 = vadd.xlane.f32.xlu0 %v282_v32  ;;  %v291_v37 = vmul.f32 %v862_v36, %v862_v36 }
 0x121   :  { %306 = vadd.xlane.f32.xlu1 %v283_v34 }
 0x122   :  { %314 = vadd.xlane.f32.xlu2 %v287_v35 }
 0x127   :  { %322 = vadd.xlane.f32.xlu0 %v291_v37 }
 0x129   :  { %318 = vadd.xlane.f32.xlu1 %v289_v38 }
 0x12a   :  { %320 = vadd.xlane.f32.xlu2 %v290_v39 }
 0x16d   :  { %v293_v40 = vpop.xlane.xlu1 %292 }
 0x16e   :  { %634 = vrsqrt.f32 %v293_v40  ;;  %vm330_vm2 = vweird.f32 %v293_v40  ;;  %vm500_vm5 = vcmp.gt.f32.partialorder %v293_v40, 0.0 }
 0x172   :  { %v309_v41 = vpop.xlane.xlu2 %308 }
 0x173   :  { %636 = vrsqrt.f32 %v309_v41  ;;  %vm410_vm6 = vweird.f32 %v309_v41  ;;  %vm508_vm10 = vcmp.gt.f32.partialorder %v309_v41, 0.0 }
 0x174   :  { %v635_v42 = vpop.eup %634 }
 0x175   :  { %v325_v43 = vmul.f32 %v635_v42, %v293_v40  ;;  %v870_v44 = vpop.xlane.xlu1 %300  ;;  %vm331_vm0 = vweird.f32 %v635_v42 }
 0x176   :  { %638 = vrsqrt.f32 %v870_v44  ;;  %vm332_vm3 = vmor %vm330_vm2, %vm331_vm0  ;;  %vm370_vm9 = vweird.f32 %v870_v44  ;;  %vm504_vm13 = vcmp.gt.f32.partialorder %v870_v44, 0.0 }
 0x177   :  { %v326_v45 = vmul.f32 %v635_v42, %v325_v43 }
 0x179   :  { %v637_v46 = vpop.eup %636  ;;  %v327_v47 = vmul.f32 0.5, %v326_v45 }
 0x17a   :  { %v405_v48 = vmul.f32 %v637_v46, %v309_v41  ;;  %v873_v49 = vpop.xlane.xlu0 %316  ;;  %vm411_vm4 = vweird.f32 %v637_v46 }
 0x17b   :  { %v328_v50 = vsub.f32 1.5, %v327_v47  ;;  %640 = vrsqrt.f32 %v873_v49  ;;  %vm412_vm7 = vmor %vm410_vm6, %vm411_vm4  ;;  %vm450_vm14 = vweird.f32 %v873_v49  ;;  %vm512_vm2 = vcmp.gt.f32.partialorder %v873_v49, 0.0 }
 0x17c   :  { %v639_v51 = vpop.eup %638  ;;  %v406_v52 = vmul.f32 %v637_v46, %v405_v48  ;;  %v876_v53 = vpop.xlane.xlu2 %294 }
 0x17d   :  { %v329_v54 = vmul.f32 %v635_v42, %v328_v50  ;;  %v365_v55 = vmul.f32 %v639_v51, %v870_v44  ;;  %642 = vrsqrt.f32 %v876_v53  ;;  %vm371_vm8 = vweird.f32 %v639_v51 }
 0x17e   :  { %v407_v56 = vmul.f32 0.5, %v406_v52  ;;  %vm372_vm11 = vmor %vm370_vm9, %vm371_vm8  ;;  %vm340_vm0 = vweird.f32 %v876_v53  ;;  %vm501_vm4 = vcmp.gt.f32.partialorder %v876_v53, 0.0 }
 0x17f   :  { %v333_v57 = vsel %vm332_vm3, %v635_v42, %v329_v54  ;;  %v366_v58 = vmul.f32 %v639_v51, %v365_v55 }
 0x180   :  { %v484_v59 = vmin.f32 %v333_v57, 1.0  ;;  %v408_v60 = vsub.f32 1.5, %v407_v56 }
 0x181   :  { %v641_v61 = vpop.eup %640  ;;  %v367_v62 = vmul.f32 0.5, %v366_v58 }
 0x182   :  { %v516_v63 = vsel %vm500_vm5, %v484_v59, 1.0  ;;  %v409_v0 = vmul.f32 %v637_v46, %v408_v60  ;;  %v445_v1 = vmul.f32 %v641_v61, %v873_v49  ;;  %v881_v2 = vpop.xlane.xlu0 %310  ;;  %v883_v3 = vpop.xlane.xlu1 %312  ;;  %vm451_vm12 = vweird.f32 %v641_v61 }
 0x183   :  { %v643_v4 = vpop.eup %642  ;;  %v532_v5 = vmul.f32 %v516_v63, %v806_v8  ;;  %v368_v6 = vsub.f32 1.5, %v367_v62  ;;  %644 = vrsqrt.f32 %v881_v2  ;;  %vm452_vm1 = vmor %vm450_vm14, %vm451_vm12  ;;  %vm420_vm6 = vweird.f32 %v881_v2 }
 0x184   :  { %v413_v7 = vsel %vm412_vm7, %v637_v46, %v409_v0  ;;  %v446_v9 = vmul.f32 %v641_v61, %v445_v1  ;;  %v335_v11 = vmul.f32 %v643_v4, %v876_v53  ;;  %v888_v13 = vpop.xlane.xlu2 %302  ;;  %646 = vrsqrt.f32 %v883_v3 }
 0x185   :  { %548 = vst [vmem:[#allocation2] sm:$0xff] %v532_v5  ;;  %v492_v16 = vmin.f32 %v413_v7, 1.0  ;;  %v369_v18 = vmul.f32 %v639_v51, %v368_v6  ;;  %648 = vrsqrt.f32 %v888_v13  ;;  %vm341_vm15 = vweird.f32 %v643_v4 }
 0x186   :  { %v447_v8 = vmul.f32 0.5, %v446_v9  ;;  %v336_v21 = vmul.f32 %v643_v4, %v335_v11  ;;  %vm342_vm3 = vmor %vm340_vm0, %vm341_vm15  ;;  %vm509_vm9 = vcmp.gt.f32.partialorder %v881_v2, 0.0  ;;  %vm380_vm14 = vweird.f32 %v888_v13 }
 0x187   :  { %v524_v22 = vsel %vm508_vm10, %v492_v16, 1.0  ;;  %v373_v25 = vsel %vm372_vm11, %v639_v51, %v369_v18  ;;  %vm430_vm10 = vweird.f32 %v883_v3 }
 0x188   :  { %v540_v26 = vmul.f32 %v524_v22, %v810_v10  ;;  %v488_v30 = vmin.f32 %v373_v25, 1.0  ;;  %v448_v32 = vsub.f32 1.5, %v447_v8  ;;  %v337_v34 = vmul.f32 0.5, %v336_v21 }
 0x189   :  { %v645_v35 = vpop.eup %644 }
 0x18a   :  { %556 = vst [vmem:[#allocation2 + $0x40] sm:$0xff] %v540_v26  ;;  %v520_v37 = vsel %vm504_vm13, %v488_v30, 1.0  ;;  %v449_v38 = vmul.f32 %v641_v61, %v448_v32  ;;  %v338_v39 = vsub.f32 1.5, %v337_v34  ;;  %v415_v40 = vmul.f32 %v645_v35, %v881_v2  ;;  %v897_v41 = vpop.xlane.xlu0 %296  ;;  %v647_v42 = vpop.eup %646 }
 0x18b   :  { %v536_v10 = vmul.f32 %v520_v37, %v814_v12  ;;  %650 = vrsqrt.f32 %v897_v41  ;;  %v425_v46 = vmul.f32 %v647_v42, %v883_v3  ;;  %v649_v47 = vpop.eup %648  ;;  %vm421_vm5 = vweird.f32 %v645_v35 }
 0x18c   :  { %v453_v43 = vsel %vm452_vm1, %v641_v61, %v449_v38  ;;  %v339_v44 = vmul.f32 %v643_v4, %v338_v39  ;;  %v416_v45 = vmul.f32 %v645_v35, %v415_v40  ;;  %v375_v54 = vmul.f32 %v649_v47, %v888_v13  ;;  %vm422_vm8 = vmor %vm420_vm6, %vm421_vm5 }
 0x18d   :  { %552 = vst [vmem:[#allocation2 + $0x20] sm:$0xff] %v536_v10  ;;  %v496_v48 = vmin.f32 %v453_v43, 1.0  ;;  %v907_v12 = vpop.xlane.xlu2 %298  ;;  %v426_v52 = vmul.f32 %v647_v42, %v425_v46  ;;  %vm431_vm7 = vweird.f32 %v647_v42  ;;  %vm381_vm11 = vweird.f32 %v649_v47 }
 0x18e   :  { %v343_v50 = vsel %vm342_vm3, %v643_v4, %v339_v44  ;;  %v417_v51 = vmul.f32 0.5, %v416_v45  ;;  %652 = vrsqrt.f32 %v907_v12  ;;  %v376_v59 = vmul.f32 %v649_v47, %v375_v54  ;;  %vm432_vm12 = vmor %vm430_vm10, %vm431_vm7 }
 0x18f   :  { %v528_v55 = vsel %vm512_vm2, %v496_v48, 1.0  ;;  %v485_v56 = vmin.f32 %v343_v50, 1.0  ;;  %v427_v49 = vmul.f32 0.5, %v426_v52  ;;  %vm510_vm13 = vcmp.gt.f32.partialorder %v883_v3, 0.0  ;;  %vm382_vm15 = vmor %vm380_vm14, %vm381_vm11 }
 0x190   :  { %v544_v57 = vmul.f32 %v528_v55, %v820_v15  ;;  %v418_v58 = vsub.f32 1.5, %v417_v51  ;;  %v377_v0 = vmul.f32 0.5, %v376_v59  ;;  %vm505_vm1 = vcmp.gt.f32.partialorder %v888_v13, 0.0 }
 0x191   :  { %v912_v60 = vpop.eup %650  ;;  %v517_v53 = vsel %vm501_vm4, %v485_v56, 1.0  ;;  %v428_v63 = vsub.f32 1.5, %v427_v49  ;;  %vm350_vm2 = vweird.f32 %v897_v41  ;;  %vm502_vm5 = vcmp.gt.f32.partialorder %v897_v41, 0.0 }
 0x192   :  { %560 = vst [vmem:[#allocation2 + $0x60] sm:$0xff] %v544_v57  ;;  %v533_v61 = vmul.f32 %v517_v53, %v824_v17  ;;  %v419_v62 = vmul.f32 %v645_v35, %v418_v58  ;;  %v916_v1 = vpop.xlane.xlu0 %304  ;;  %v345_v15 = vmul.f32 %v912_v60, %v897_v41  ;;  %v378_v17 = vsub.f32 1.5, %v377_v0 }
 0x193   :  { %654 = vrsqrt.f32 %v916_v1  ;;  %v429_v5 = vmul.f32 %v647_v42, %v428_v63  ;;  %vm351_vm0 = vweird.f32 %v912_v60  ;;  %vm360_vm6 = vweird.f32 %v907_v12 }
 0x194   :  { %549 = vst [vmem:[#allocation2 + $0x8] sm:$0xff] %v533_v61  ;;  %v423_v4 = vsel %vm422_vm8, %v645_v35, %v419_v62  ;;  %v924_v6 = vpop.xlane.xlu1 %306  ;;  %v926_v7 = vpop.eup %652  ;;  %v346_v11 = vmul.f32 %v912_v60, %v345_v15  ;;  %v379_v8 = vmul.f32 %v649_v47, %v378_v17  ;;  %vm352_vm4 = vmor %vm350_vm2, %vm351_vm0  ;;  %vm503_vm8 = vcmp.gt.f32.partialorder %v907_v12, 0.0 }
 0x195   :  { %v493_v9 = vmin.f32 %v423_v4, 1.0  ;;  %v931_v16 = vpop.xlane.xlu2 %314  ;;  %656 = vrsqrt.f32 %v924_v6  ;;  %v433_v18 = vsel %vm432_vm12, %v647_v42, %v429_v5  ;;  %v355_v21 = vmul.f32 %v926_v7, %v907_v12 }
 0x196   :  { %v494_v25 = vmin.f32 %v433_v18, 1.0  ;;  %v347_v26 = vmul.f32 0.5, %v346_v11  ;;  %658 = vrsqrt.f32 %v931_v16  ;;  %v383_v32 = vsel %vm382_vm15, %v649_v47, %v379_v8 }
 0x197   :  { %v525_v22 = vsel %vm509_vm9, %v493_v9, 1.0  ;;  %v356_v34 = vmul.f32 %v926_v7, %v355_v21  ;;  %v489_v38 = vmin.f32 %v383_v32, 1.0  ;;  %vm361_vm3 = vweird.f32 %v926_v7 }
 0x198   :  { %v541_v30 = vmul.f32 %v525_v22, %v818_v14  ;;  %v526_v37 = vsel %vm510_vm13, %v494_v25, 1.0  ;;  %v348_v2 = vsub.f32 1.5, %v347_v26  ;;  %vm362_vm7 = vmor %vm360_vm6, %vm361_vm3  ;;  %vm390_vm10 = vweird.f32 %v916_v1 }
 0x199   :  { %v655_v35 = vpop.eup %654  ;;  %v542_v39 = vmul.f32 %v526_v37, %v830_v20  ;;  %v357_v40 = vmul.f32 0.5, %v356_v34  ;;  %v521_v10 = vsel %vm505_vm1, %v489_v38, 1.0  ;;  %vm506_vm14 = vcmp.gt.f32.partialorder %v916_v1, 0.0 }
 0x19a   :  { %557 = vst [vmem:[#allocation2 + $0x48] sm:$0xff] %v541_v30  ;;  %v385_v14 = vmul.f32 %v655_v35, %v916_v1  ;;  %v950_v42 = vpop.xlane.xlu0 %322  ;;  %v349_v3 = vmul.f32 %v912_v60, %v348_v2  ;;  %v537_v43 = vmul.f32 %v521_v10, %v828_v19  ;;  %vm391_vm9 = vweird.f32 %v655_v35 }
 0x19b   :  { %v952_v13 = vpop.eup %656  ;;  %660 = vrsqrt.f32 %v950_v42  ;;  %558 = vst [vmem:[#allocation2 + $0x50] sm:$0xff] %v542_v39  ;;  %v358_v20 = vsub.f32 1.5, %v357_v40  ;;  %vm392_vm12 = vmor %vm390_vm10, %vm391_vm9  ;;  %vm400_vm15 = vweird.f32 %v924_v6  ;;  %vm440_vm1 = vweird.f32 %v931_v16 }
 0x19c   :  { %v386_v44 = vmul.f32 %v655_v35, %v385_v14  ;;  %v395_v45 = vmul.f32 %v952_v13, %v924_v6  ;;  %v659_v46 = vpop.eup %658  ;;  %v353_v47 = vsel %vm352_vm4, %v912_v60, %v349_v3  ;;  %553 = vst [vmem:[#allocation2 + $0x28] sm:$0xff] %v537_v43  ;;  %v973_v58 = vpop.xlane.xlu1 %318  ;;  %vm401_vm11 = vweird.f32 %v952_v13 }
 0x19d   :  { %v963_v48 = vpop.xlane.xlu2 %320  ;;  %v486_v50 = vmin.f32 %v353_v47, 1.0  ;;  %v359_v51 = vmul.f32 %v926_v7, %v358_v20  ;;  %v435_v52 = vmul.f32 %v659_v46, %v931_v16  ;;  %vm441_vm13 = vweird.f32 %v659_v46  ;;  %vm402_vm0 = vmor %vm400_vm15, %vm401_vm11 }
 0x19e   :  { %v387_v19 = vmul.f32 0.5, %v386_v44  ;;  %v396_v54 = vmul.f32 %v952_v13, %v395_v45  ;;  %662 = vrsqrt.f32 %v963_v48  ;;  %vm442_vm2 = vmor %vm440_vm1, %vm441_vm13  ;;  %vm511_vm4 = vcmp.gt.f32.partialorder %v931_v16, 0.0 }
 0x19f   :  { %v518_v41 = vsel %vm502_vm5, %v486_v50, 1.0  ;;  %v363_v55 = vsel %vm362_vm7, %v926_v7, %v359_v51  ;;  %v436_v57 = vmul.f32 %v659_v46, %v435_v52  ;;  %664 = vrsqrt.f32 %v973_v58 }
 0x1a0   :  { %v388_v56 = vsub.f32 1.5, %v387_v19  ;;  %v534_v59 = vmul.f32 %v518_v41, %v838_v24  ;;  %v487_v60 = vmin.f32 %v363_v55, 1.0  ;;  %v397_v53 = vmul.f32 0.5, %v396_v54 }
 0x1a1   :  { %v661_v49 = vpop.eup %660  ;;  %v437_v62 = vmul.f32 0.5, %v436_v57  ;;  %vm507_vm5 = vcmp.gt.f32.partialorder %v924_v6, 0.0  ;;  %vm480_vm6 = vweird.f32 %v950_v42  ;;  %vm515_vm9 = vcmp.gt.f32.partialorder %v950_v42, 0.0 }
 0x1a2   :  { %v389_v61 = vmul.f32 %v655_v35, %v388_v56  ;;  %v475_v63 = vmul.f32 %v661_v49, %v950_v42  ;;  %550 = vst [vmem:[#allocation2 + $0x10] sm:$0xff] %v534_v59  ;;  %v519_v0 = vsel %vm503_vm8, %v487_v60, 1.0  ;;  %v398_v15 = vsub.f32 1.5, %v397_v53 }
 0x1a3   :  { %v535_v24 = vmul.f32 %v519_v0, %v846_v28  ;;  %v438_v5 = vsub.f32 1.5, %v437_v62  ;;  %vm481_vm3 = vweird.f32 %v661_v49  ;;  %vm470_vm10 = vweird.f32 %v963_v48 }
 0x1a4   :  { %v393_v4 = vsel %vm392_vm12, %v655_v35, %v389_v61  ;;  %v476_v17 = vmul.f32 %v661_v49, %v475_v63  ;;  %v663_v7 = vpop.eup %662  ;;  %v399_v11 = vmul.f32 %v952_v13, %v398_v15  ;;  %vm482_vm7 = vmor %vm480_vm6, %vm481_vm3  ;;  %vm460_vm13 = vweird.f32 %v973_v58 }
 0x1a5   :  { %v490_v9 = vmin.f32 %v393_v4, 1.0  ;;  %551 = vst [vmem:[#allocation2 + $0x18] sm:$0xff] %v535_v24  ;;  %v439_v12 = vmul.f32 %v659_v46, %v438_v5  ;;  %v465_v28 = vmul.f32 %v663_v7, %v963_v48  ;;  %v665_v30 = vpop.eup %664  ;;  %vm471_vm8 = vweird.f32 %v663_v7 }
 0x1a6   :  { %v477_v18 = vmul.f32 0.5, %v476_v17  ;;  %v403_v21 = vsel %vm402_vm0, %v952_v13, %v399_v11  ;;  %v455_v38 = vmul.f32 %v665_v30, %v973_v58  ;;  %vm472_vm11 = vmor %vm470_vm10, %vm471_vm8  ;;  %vm461_vm12 = vweird.f32 %v665_v30 }
 0x1a7   :  { %v522_v8 = vsel %vm506_vm14, %v490_v9, 1.0  ;;  %v443_v22 = vsel %vm442_vm2, %v659_v46, %v439_v12  ;;  %v491_v25 = vmin.f32 %v403_v21, 1.0  ;;  %v466_v34 = vmul.f32 %v663_v7, %v465_v28  ;;  %vm462_vm15 = vmor %vm460_vm13, %vm461_vm12 }
 0x1a8   :  { %v538_v1 = vmul.f32 %v522_v8, %v844_v27  ;;  %v478_v26 = vsub.f32 1.5, %v477_v18  ;;  %v495_v32 = vmin.f32 %v443_v22, 1.0  ;;  %v456_v16 = vmul.f32 %v665_v30, %v455_v38 }
 0x1a9   :  { %v523_v35 = vsel %vm507_vm5, %v491_v25, 1.0  ;;  %v467_v39 = vmul.f32 0.5, %v466_v34  ;;  %vm514_vm14 = vcmp.gt.f32.partialorder %v963_v48, 0.0  ;;  %vm513_vm1 = vcmp.gt.f32.partialorder %v973_v58, 0.0 }
 0x1aa   :  { %554 = vst [vmem:[#allocation2 + $0x30] sm:$0xff] %v538_v1  ;;  %v479_v37 = vmul.f32 %v661_v49, %v478_v26  ;;  %v527_v2 = vsel %vm511_vm4, %v495_v32, 1.0  ;;  %v539_v27 = vmul.f32 %v523_v35, %v856_v33  ;;  %v457_v10 = vmul.f32 0.5, %v456_v16 }
 0x1ab   :  { %v543_v40 = vmul.f32 %v527_v2, %v852_v31  ;;  %v468_v13 = vsub.f32 1.5, %v467_v39 }
 0x1ac   :  { %v483_v14 = vsel %vm482_vm7, %v661_v49, %v479_v37  ;;  %555 = vst [vmem:[#allocation2 + $0x38] sm:$0xff] %v539_v27  ;;  %v458_v20 = vsub.f32 1.5, %v457_v10 }
 0x1ad   :  { %v499_v6 = vmin.f32 %v483_v14, 1.0  ;;  %559 = vst [vmem:[#allocation2 + $0x58] sm:$0xff] %v543_v40  ;;  %v469_v43 = vmul.f32 %v663_v7, %v468_v13 }
 0x1ae   :  { %v459_v45 = vmul.f32 %v665_v30, %v458_v20 }
 0x1af   :  { %v531_v3 = vsel %vm515_vm9, %v499_v6, 1.0  ;;  %v473_v31 = vsel %vm472_vm11, %v663_v7, %v469_v43 }
 0x1b0   :  { %v547_v33 = vmul.f32 %v531_v3, %v862_v36  ;;  %v498_v44 = vmin.f32 %v473_v31, 1.0  ;;  %v463_v46 = vsel %vm462_vm15, %v665_v30, %v459_v45 }
 0x1b1   :  { %v497_v47 = vmin.f32 %v463_v46, 1.0 }
 0x1b2   :  { %563 = vst [vmem:[#allocation2 + $0x78] sm:$0xff] %v547_v33  ;;  %v530_v42 = vsel %vm514_vm14, %v498_v44, 1.0 }
 0x1b3   :  { %v546_v36 = vmul.f32 %v530_v42, %v848_v29  ;;  %v529_v50 = vsel %vm513_vm1, %v497_v47, 1.0 }
 0x1b4   :  { %v545_v48 = vmul.f32 %v529_v50, %v836_v23 }
 0x1b5   :  { %562 = vst [vmem:[#allocation2 + $0x70] sm:$0xff] %v546_v36 }
 0x1b6   :  { %561 = vst [vmem:[#allocation2 + $0x68] sm:$0xff] %v545_v48 }
 0x1b7   :  { %576 = dma.vmem_to_hbm [thread:$0]  %s569_s20, 2048, %s571_s23, [#allocation3], %s695_s24, %s695_s24, %s696_s25  }
 0x1b8   :  { %690 = dma.done.wait [#allocation3], 2048  }
 0x1b9   :  { %691 = vsyncadd [#allocation3], 4294965248 }
 0x1ba   :  { %581 = vsyncpa [#allocation3], 1 }

</bundles_post_ra>
